<compile_context>
chip_gen: v6e
topology: v6e:2x2x1
jax: 0.10.0
libtpu: 0.0.40
codegen_flags: <defaults>
</compile_context>

<pallas_src>
import math

import jax
import jax.numpy as jnp
from jax.experimental import pallas as pl
from jax.experimental.pallas import tpu as pltpu

_EPS = 1e-5


def _bn(x, axes):
    """BatchNorm with training-mode batch statistics, identity affine.

    Single reduction pass: var = E[x^2] - E[x]^2 (inputs are tanh-bounded or
    O(1) post-FC, so the one-pass form is numerically safe in f32)."""
    m = jnp.mean(x, axis=axes, keepdims=True)
    m2 = jnp.mean(x * x, axis=axes, keepdims=True)
    v = jnp.maximum(m2 - m * m, 0.0)
    return (x - m) * jax.lax.rsqrt(v + _EPS)


# ---------------------------------------------------------------------------
# Stage 1: once-per-timestep pre-score pipeline -> y of shape (B, D)
# ---------------------------------------------------------------------------
def _pre_kernel(e1_ref, rel_ref, w_ref, cb_ref, fcw_ref, fcb_ref, y_ref):
    """tanh -> bn0 -> conv1d(k=3,'same') -> bn1 -> relu -> fc -> bn2 -> relu.

    e1_ref  : (B, D)    VMEM  raw gathered subject-entity embedding rows (f32)
    rel_ref : (B, D)    VMEM  raw gathered relation embedding rows (f32)
    w_ref   : (6, C)    SMEM  conv weights, row = in_channel*3 + tap (d-1, d, d+1)
    cb_ref  : (C,)      SMEM  conv bias
    fcw_ref : (C*D, D)  VMEM  fc weight transposed; row c*D+d == W_fc[:, c*D+d]
    fcb_ref : (1, D)    VMEM  fc bias
    y_ref   : (B, D)    VMEM  output (pre-score hidden state)
    """
    B, D = e1_ref.shape
    C = cb_ref.shape[0]
    f32 = jnp.float32

    # channel 0 = entity, channel 1 = relation; bn0 is per-channel over (B, D).
    x0 = _bn(jnp.tanh(e1_ref[...]), (0, 1))
    x1 = _bn(jnp.tanh(rel_ref[...]), (0, 1))
    # inp_drop: p = 0 -> identity.

    # Width-3 "same" conv taps via XLU lane rotation.  pltpu.roll is circular,
    # so the wrapped lane is masked to zero to preserve zero-padding semantics.
    lane = jax.lax.broadcasted_iota(jnp.int32, (B, D), 1)

    def taps(x):
        prev = jnp.where(lane == 0, 0.0, pltpu.roll(x, 1, 1))          # x[:, d-1]
        nxt = jnp.where(lane == D - 1, 0.0, pltpu.roll(x, D - 1, 1))   # x[:, d+1]
        return prev, x, nxt

    shifted = [*taps(x0), *taps(x1)]          # index = in_channel*3 + tap

    # Per-channel conv accumulate (scalar weights read from SMEM, VPU broadcast
    # FMAs), bn1 + relu per channel, then concatenate along lanes into the
    # flattened (B, C*D) layout so the FC is a single MXU contraction (K = C*D)
    # instead of C small matmuls.  All of this runs once per timestep.
    chans = []
    for c in range(C):
        acc = w_ref[0, c] * shifted[0]
        for r in range(1, 6):
            acc = acc + w_ref[r, c] * shifted[r]
        acc = acc + cb_ref[c]                 # conv bias
        acc = _bn(acc, (0, 1))                # bn1: per feature-map channel
        chans.append(jnp.maximum(acc, 0.0))   # relu; feature_map_drop p=0
    feat = jnp.concatenate(chans, axis=1)     # (B, C*D), flat index = c*D + d

    y = fcb_ref[...] + jnp.dot(feat, fcw_ref[...], preferred_element_type=f32)
    # hidden_drop: p = 0 -> identity.
    if B > 1:                                 # matches `if batch_size > 1` (static)
        y = _bn(y, (0,))                      # bn2: per feature over the batch
    y_ref[...] = jnp.maximum(y, 0.0)


# ---------------------------------------------------------------------------
# Stage 2: score matmul, entity table tiled & double-buffered over N
# ---------------------------------------------------------------------------
def _score_kernel(y_ref, emb_ref, out_ref):
    """One entity tile: out = y @ tanh(emb_tile).T   ((B,D) x (TN,D) -> (B,TN)).

    tanh of the tile stays fused: the phase is HBM-bound on streaming the table
    and the EUP work hides under the tile DMA.  When the table is stored bf16
    at rest, the MXU operands are bf16 and the accumulate stays f32.
    """
    # TODO(synk): if a bundle dump shows a per-tile XLU transpose of the bf16
    # RHS becoming the critical slot, stream the table as (D, N) column tiles
    # so the contraction is (1,)x(0,) and feeds the MXU directly.
    e = emb_ref[...]
    if e.dtype == jnp.bfloat16:
        e_t = jnp.tanh(e.astype(jnp.float32)).astype(jnp.bfloat16)
        y = y_ref[...].astype(jnp.bfloat16)
    else:
        e_t = jnp.tanh(e)
        y = y_ref[...]
    out_ref[...] = jax.lax.dot_general(
        y, e_t, (((1,), (1,)), ((), ())), preferred_element_type=jnp.float32)


def _pick_entity_tile(n, d, itemsize, stream_budget_bytes=8 * 1024 * 1024):
    """Entity-tile rows for the score stream.

    Per-grid-step overhead is ~0.35 us, so tiles must be large (>= 1024 rows,
    >= ~1 MiB) to keep the streaming phase HBM-bound rather than step-overhead
    bound — especially on v7x's 3.2 TB/s HBM.  Picks the largest power-of-two
    multiple of 512 (lane-dense output) capped at 4096 whose double-buffered
    stream fits the budget, then shrinks so the grid has >= 2 steps so v7x's
    two TensorCores each own a slice under dimension_semantics=("parallel",).
    The double-buffered tiles stay far inside scoped VMEM on all generations
    (v5e 16 MiB / v6e 32 MiB / v7x 32 MiB defaults)."""
    if n <= 1024:
        return n                         # whole (small) table in one tile
    tn = 4096
    while tn > 512 and 2 * tn * d * itemsize > stream_budget_bytes:
        tn //= 2
    while tn > 512 and -(-n // tn) < 2:  # keep >= 2 grid steps for megacore
        tn //= 2
    return tn


# ---------------------------------------------------------------------------
# Per-timestep dispatch (jit'd: gathers + repack + both pallas_calls)
# ---------------------------------------------------------------------------
@jax.jit
def _timestep(emb, rel_tab, triplets, conv_w, conv_b, fc_w, fc_b):
    N, D = emb.shape
    B = triplets.shape[0]
    C = conv_w.shape[0]
    K = conv_w.shape[2]
    f32 = jnp.float32

    # Row gathers (XLA glue).  When the score table is stored bf16-at-rest the
    # gathered rows are cast back to f32 so stage-1 numerics stay f32.
    e1_rows = emb[triplets[:, 0]].astype(f32)
    rel_rows = rel_tab[triplets[:, 1]].astype(f32)

    # Parameter repacking (once per timestep).
    w6c = jnp.transpose(conv_w, (1, 2, 0)).reshape(2 * K, C).astype(f32)
    fcw = jnp.transpose(fc_w).astype(f32)            # (C*D, D), row c*D + d
    fcb = fc_b.reshape(1, D).astype(f32)

    # Stage 1: hoisted pre-score pipeline (runs once, not per entity tile).
    y = pl.pallas_call(
        _pre_kernel,
        out_shape=jax.ShapeDtypeStruct((B, D), f32),
        in_specs=[
            pl.BlockSpec(memory_space=pltpu.MemorySpace.VMEM),   # e1 rows
            pl.BlockSpec(memory_space=pltpu.MemorySpace.VMEM),   # rel rows
            pl.BlockSpec(memory_space=pltpu.MemorySpace.SMEM),   # conv weights
            pl.BlockSpec(memory_space=pltpu.MemorySpace.SMEM),   # conv bias
            pl.BlockSpec(memory_space=pltpu.MemorySpace.VMEM),   # fc weight
            pl.BlockSpec(memory_space=pltpu.MemorySpace.VMEM),   # fc bias
        ],
        out_specs=pl.BlockSpec(memory_space=pltpu.MemorySpace.VMEM),
    )(e1_rows, rel_rows, w6c, conv_b.astype(f32), fcw, fcb)

    # Pad the batch to a full sublane group (8 rows f32 / 16 rows bf16) AFTER
    # stage 1 so batch-norm statistics only see real rows; padded score rows
    # are sliced off below.  Keeps the (B, TN) output stores unmasked.
    sub = 16 if emb.dtype == jnp.bfloat16 else 8
    b_pad = -(-B // sub) * sub
    if b_pad != B:
        y = jnp.pad(y, ((0, b_pad - B), (0, 0)))

    # Stage 2: stream the entity table tile-by-tile (auto double-buffered).
    tn = _pick_entity_tile(N, D, emb.dtype.itemsize)
    out = pl.pallas_call(
        _score_kernel,
        out_shape=jax.ShapeDtypeStruct((b_pad, N), f32),
        grid=(pl.cdiv(N, tn),),
        in_specs=[
            pl.BlockSpec((b_pad, D), lambda j: (0, 0)),   # y: grid-invariant
            pl.BlockSpec((tn, D), lambda j: (j, 0)),      # streamed entity tile
        ],
        out_specs=pl.BlockSpec((b_pad, tn), lambda j: (0, j)),  # lane-dense
        compiler_params=pltpu.CompilerParams(
            dimension_semantics=("parallel",),            # v7x: shard N over 2 TCs
        ),
    )(y, emb)
    return out[:B] if b_pad != B else out


def tconv_transe_forward(embedding_list, emb_rel_list, triplets, params,
                         partial_embeding=None, score_table_dtype=None):
    """Mirrors TConvTransE.forward; returns a list of (B, num_entities) scores.

    score_table_dtype=jnp.bfloat16 stores the entity table bf16-at-rest (cast
    once here, before the kernels) which halves the dominant HBM stream of the
    score phase; f32 accumulation is preserved inside the kernel.
    """
    # TODO(synk): fold the L-timestep loop, the e1/rel row gathers and both
    # stages into ONE pallas_call via PrefetchScalarGridSpec (triplets as
    # scalar prefetch, timestep as an 'arbitrary' leading grid axis, y held in
    # VMEM scratch) to cut the remaining per-timestep dispatches.
    scores = []
    for idx in range(len(embedding_list)):
        emb = embedding_list[idx]
        if score_table_dtype is not None:
            emb = emb.astype(score_table_dtype)      # table at rest in bf16
        p = params[idx]
        x = _timestep(emb, emb_rel_list[idx], triplets,
                      p["conv_w"], p["conv_b"], p["fc_w"], p["fc_b"])
        if partial_embeding is not None:
            x = x * partial_embeding                 # glue: elementwise mask
        scores.append(x)
    return scores


# ---------------------------------------------------------------------------
# Pure-JAX reference (same math, via lax.conv) for the correctness check.
# ---------------------------------------------------------------------------
def _ref_timestep(emb, rel_tab, triplets, conv_w, conv_b, fc_w, fc_b):
    hi = jax.lax.Precision.HIGHEST
    e_all = jnp.tanh(emb)
    r_all = jnp.tanh(rel_tab)
    e1 = e_all[triplets[:, 0]][:, None, :]
    rr = r_all[triplets[:, 1]][:, None, :]
    x = jnp.concatenate([e1, rr], axis=1)                       # (B, 2, D) NCW
    x = _bn(x, (0, 2))
    x = jax.lax.conv_general_dilated(
        x, conv_w, window_strides=(1,), padding=[(1, 1)],
        dimension_numbers=('NCH', 'OIH', 'NCH'),
        precision=hi) + conv_b[None, :, None]
    x = _bn(x, (0, 2))
    x = jax.nn.relu(x)
    bsz = x.shape[0]
    x = x.reshape(bsz, -1)
    x = jnp.dot(x, fc_w.T, precision=hi) + fc_b
    if bsz > 1:
        x = _bn(x, (0,))
    x = jax.nn.relu(x)
    return jnp.dot(x, e_all.T, precision=hi)


if __name__ == "__main__":
    key = jax.random.PRNGKey(0)
    num_entities, num_rels = 2048, 16
    D, C, B, L = 128, 4, 8, 2         # embedding_dim, channels, batch, sequence_len
    K = 3                             # kernel_size

    keys = jax.random.split(key, 3 + 6 * L)
    ki = iter(keys)

    # Deterministic synthetic inputs / parameters.
    embedding_list = [0.5 * jax.random.normal(next(ki), (num_entities, D), jnp.float32)
                      for _ in range(L)]
    emb_rel_list = [0.5 * jax.random.normal(next(ki), (num_rels, D), jnp.float32)
                    for _ in range(L)]
    subj = jax.random.randint(next(ki), (B,), 0, num_entities)
    rel = jax.random.randint(next(ki), (B,), 0, num_rels)
    obj = jax.random.randint(next(ki), (B,), 0, num_entities)
    triplets = jnp.stack([subj, rel, obj], axis=1).astype(jnp.int32)

    params = []
    for _ in range(L):
        params.append({
            "conv_w": 0.3 * jax.random.normal(next(ki), (C, 2, K), jnp.float32),
            "conv_b": 0.1 * jax.random.normal(next(ki), (C,), jnp.float32),
            "fc_w": (1.0 / math.sqrt(C * D)) *
                    jax.random.normal(next(ki), (D, C * D), jnp.float32),
            "fc_b": 0.1 * jax.random.normal(next(ki), (D,), jnp.float32),
        })

    # References (f32, HIGHEST precision).
    refs = []
    for idx in range(L):
        r = _ref_timestep(embedding_list[idx], emb_rel_list[idx], triplets,
                          params[idx]["conv_w"], params[idx]["conv_b"],
                          params[idx]["fc_w"], params[idx]["fc_b"])
        refs.append(jax.block_until_ready(r))

    ok = True

    # (a) f32 table path: tight check.  MXU f32 matmuls may run as bf16 passes
    # depending on backend default precision, so atol scales with magnitude.
    score_f32 = tconv_transe_forward(embedding_list, emb_rel_list, triplets, params)
    score_f32 = [jax.block_until_ready(s) for s in score_f32]
    for idx in range(L):
        if score_f32[idx].shape != (B, num_entities):
            ok = False
        scale = float(jnp.max(jnp.abs(refs[idx])))
        if not jnp.allclose(score_f32[idx], refs[idx],
                            rtol=5e-3, atol=5e-3 * max(scale, 1.0)):
            ok = False

    # (b) bf16-at-rest table path (the recommended deployment config): loose
    # check — the table itself is quantized to bf16, so only verify the result
    # tracks the f32 reference to ~bf16 accuracy.
    score_bf16 = tconv_transe_forward(embedding_list, emb_rel_list, triplets, params,
                                      score_table_dtype=jnp.bfloat16)
    score_bf16 = [jax.block_until_ready(s) for s in score_bf16]
    for idx in range(L):
        if score_bf16[idx].shape != (B, num_entities):
            ok = False
        if not bool(jnp.all(jnp.isfinite(score_bf16[idx]))):
            ok = False
        scale = float(jnp.max(jnp.abs(refs[idx])))
        max_err = float(jnp.max(jnp.abs(score_bf16[idx] - refs[idx])))
        if max_err > 8e-2 * max(scale, 1.0):
            ok = False

    if ok:
        print("KERNEL_OK")
    else:
        raise SystemExit("mismatch between Pallas kernel and JAX reference")
</pallas_src>

<mosaic_0001>
module attributes {stable_mosaic.version = 11 : i64} {
  func.func @_pre_kernel(%arg0: memref<8x128xf32, #tpu.memory_space<vmem>>, %arg1: memref<8x128xf32, #tpu.memory_space<vmem>>, %arg2: memref<6x4xf32, #tpu.memory_space<smem>>, %arg3: memref<4xf32, #tpu.memory_space<smem>>, %arg4: memref<512x128xf32, #tpu.memory_space<vmem>>, %arg5: memref<1x128xf32, #tpu.memory_space<vmem>>, %arg6: memref<8x128xf32, #tpu.memory_space<vmem>>) attributes {dimension_semantics = [], scalar_prefetch = 0 : i64, scratch_operands = 0 : i64, tpu.core_type = #tpu.core_type<tc>} {
    %c0 = arith.constant 0 : index
    %c0_0 = arith.constant 0 : index
    %0 = vector.load %arg0[%c0, %c0_0] : memref<8x128xf32, #tpu.memory_space<vmem>>, vector<8x128xf32>
    %1 = math.tanh %0 : vector<8x128xf32>
    %2 = vector.shape_cast %1 : vector<8x128xf32> to vector<1x8x128xf32>
    %cst = arith.constant dense<0.000000e+00> : vector<1xf32>
    %3 = vector.multi_reduction <add>, %2, %cst [1, 2] : vector<1x8x128xf32> to vector<1xf32>
    %4 = vector.shape_cast %3 : vector<1xf32> to vector<1x1x1xf32>
    %5 = vector.extract %4[0, 0, 0] : f32 from vector<1x1x1xf32>
    %6 = vector.broadcast %5 : f32 to vector<1x1xf32>
    %cst_1 = arith.constant 1.024000e+03 : f32
    %7 = vector.broadcast %cst_1 : f32 to vector<1x1xf32>
    %8 = arith.divf %6, %7 : vector<1x1xf32>
    %9 = arith.mulf %1, %1 : vector<8x128xf32>
    %10 = vector.shape_cast %9 : vector<8x128xf32> to vector<1x8x128xf32>
    %cst_2 = arith.constant dense<0.000000e+00> : vector<1xf32>
    %11 = vector.multi_reduction <add>, %10, %cst_2 [1, 2] : vector<1x8x128xf32> to vector<1xf32>
    %12 = vector.shape_cast %11 : vector<1xf32> to vector<1x1x1xf32>
    %13 = vector.extract %12[0, 0, 0] : f32 from vector<1x1x1xf32>
    %14 = vector.broadcast %13 : f32 to vector<1x1xf32>
    %cst_3 = arith.constant 1.024000e+03 : f32
    %15 = vector.broadcast %cst_3 : f32 to vector<1x1xf32>
    %16 = arith.divf %14, %15 : vector<1x1xf32>
    %17 = arith.mulf %8, %8 : vector<1x1xf32>
    %18 = arith.subf %16, %17 : vector<1x1xf32>
    %cst_4 = arith.constant 0.000000e+00 : f32
    %19 = vector.broadcast %cst_4 : f32 to vector<1x1xf32>
    %20 = arith.maximumf %18, %19 : vector<1x1xf32>
    %21 = vector.broadcast %8 : vector<1x1xf32> to vector<8x128xf32>
    %22 = arith.subf %1, %21 : vector<8x128xf32>
    %cst_5 = arith.constant 9.99999974E-6 : f32
    %23 = vector.broadcast %cst_5 : f32 to vector<1x1xf32>
    %24 = arith.addf %20, %23 : vector<1x1xf32>
    %25 = math.rsqrt %24 : vector<1x1xf32>
    %26 = vector.broadcast %25 : vector<1x1xf32> to vector<8x128xf32>
    %27 = arith.mulf %22, %26 : vector<8x128xf32>
    %c0_6 = arith.constant 0 : index
    %c0_7 = arith.constant 0 : index
    %28 = vector.load %arg1[%c0_6, %c0_7] : memref<8x128xf32, #tpu.memory_space<vmem>>, vector<8x128xf32>
    %29 = math.tanh %28 : vector<8x128xf32>
    %30 = vector.shape_cast %29 : vector<8x128xf32> to vector<1x8x128xf32>
    %cst_8 = arith.constant dense<0.000000e+00> : vector<1xf32>
    %31 = vector.multi_reduction <add>, %30, %cst_8 [1, 2] : vector<1x8x128xf32> to vector<1xf32>
    %32 = vector.shape_cast %31 : vector<1xf32> to vector<1x1x1xf32>
    %33 = vector.extract %32[0, 0, 0] : f32 from vector<1x1x1xf32>
    %34 = vector.broadcast %33 : f32 to vector<1x1xf32>
    %cst_9 = arith.constant 1.024000e+03 : f32
    %35 = vector.broadcast %cst_9 : f32 to vector<1x1xf32>
    %36 = arith.divf %34, %35 : vector<1x1xf32>
    %37 = arith.mulf %29, %29 : vector<8x128xf32>
    %38 = vector.shape_cast %37 : vector<8x128xf32> to vector<1x8x128xf32>
    %cst_10 = arith.constant dense<0.000000e+00> : vector<1xf32>
    %39 = vector.multi_reduction <add>, %38, %cst_10 [1, 2] : vector<1x8x128xf32> to vector<1xf32>
    %40 = vector.shape_cast %39 : vector<1xf32> to vector<1x1x1xf32>
    %41 = vector.extract %40[0, 0, 0] : f32 from vector<1x1x1xf32>
    %42 = vector.broadcast %41 : f32 to vector<1x1xf32>
    %cst_11 = arith.constant 1.024000e+03 : f32
    %43 = vector.broadcast %cst_11 : f32 to vector<1x1xf32>
    %44 = arith.divf %42, %43 : vector<1x1xf32>
    %45 = arith.mulf %36, %36 : vector<1x1xf32>
    %46 = arith.subf %44, %45 : vector<1x1xf32>
    %cst_12 = arith.constant 0.000000e+00 : f32
    %47 = vector.broadcast %cst_12 : f32 to vector<1x1xf32>
    %48 = arith.maximumf %46, %47 : vector<1x1xf32>
    %49 = vector.broadcast %36 : vector<1x1xf32> to vector<8x128xf32>
    %50 = arith.subf %29, %49 : vector<8x128xf32>
    %cst_13 = arith.constant 9.99999974E-6 : f32
    %51 = vector.broadcast %cst_13 : f32 to vector<1x1xf32>
    %52 = arith.addf %48, %51 : vector<1x1xf32>
    %53 = math.rsqrt %52 : vector<1x1xf32>
    %54 = vector.broadcast %53 : vector<1x1xf32> to vector<8x128xf32>
    %55 = arith.mulf %50, %54 : vector<8x128xf32>
    %56 = tpu.iota {dimensions = array<i32: 1>} : vector<8x128xi32>
    %c0_i32 = arith.constant 0 : i32
    %57 = vector.broadcast %c0_i32 : i32 to vector<8x128xi32>
    %58 = arith.cmpi eq, %56, %57 : vector<8x128xi32>
    %c1_i32 = arith.constant 1 : i32
    %59 = tpu.dynamic_rotate %27 by %c1_i32 dim 1 : vector<8x128xf32>, i32 -> vector<8x128xf32>
    %cst_14 = arith.constant 0.000000e+00 : f32
    %60 = vector.broadcast %cst_14 : f32 to vector<8x128xf32>
    %61 = arith.select %58, %60, %59 : vector<8x128xi1>, vector<8x128xf32>
    %c127_i32 = arith.constant 127 : i32
    %62 = vector.broadcast %c127_i32 : i32 to vector<8x128xi32>
    %63 = arith.cmpi eq, %56, %62 : vector<8x128xi32>
    %c127_i32_15 = arith.constant 127 : i32
    %64 = tpu.dynamic_rotate %27 by %c127_i32_15 dim 1 : vector<8x128xf32>, i32 -> vector<8x128xf32>
    %cst_16 = arith.constant 0.000000e+00 : f32
    %65 = vector.broadcast %cst_16 : f32 to vector<8x128xf32>
    %66 = arith.select %63, %65, %64 : vector<8x128xi1>, vector<8x128xf32>
    %c0_i32_17 = arith.constant 0 : i32
    %67 = vector.broadcast %c0_i32_17 : i32 to vector<8x128xi32>
    %68 = arith.cmpi eq, %56, %67 : vector<8x128xi32>
    %c1_i32_18 = arith.constant 1 : i32
    %69 = tpu.dynamic_rotate %55 by %c1_i32_18 dim 1 : vector<8x128xf32>, i32 -> vector<8x128xf32>
    %cst_19 = arith.constant 0.000000e+00 : f32
    %70 = vector.broadcast %cst_19 : f32 to vector<8x128xf32>
    %71 = arith.select %68, %70, %69 : vector<8x128xi1>, vector<8x128xf32>
    %c127_i32_20 = arith.constant 127 : i32
    %72 = vector.broadcast %c127_i32_20 : i32 to vector<8x128xi32>
    %73 = arith.cmpi eq, %56, %72 : vector<8x128xi32>
    %c127_i32_21 = arith.constant 127 : i32
    %74 = tpu.dynamic_rotate %55 by %c127_i32_21 dim 1 : vector<8x128xf32>, i32 -> vector<8x128xf32>
    %cst_22 = arith.constant 0.000000e+00 : f32
    %75 = vector.broadcast %cst_22 : f32 to vector<8x128xf32>
    %76 = arith.select %73, %75, %74 : vector<8x128xi1>, vector<8x128xf32>
    %c0_23 = arith.constant 0 : index
    %c0_24 = arith.constant 0 : index
    %77 = memref.load %arg2[%c0_23, %c0_24] : memref<6x4xf32, #tpu.memory_space<smem>>
    %78 = vector.broadcast %77 : f32 to vector<8x128xf32>
    %79 = arith.mulf %78, %61 : vector<8x128xf32>
    %c1 = arith.constant 1 : index
    %c0_25 = arith.constant 0 : index
    %80 = memref.load %arg2[%c1, %c0_25] : memref<6x4xf32, #tpu.memory_space<smem>>
    %81 = vector.broadcast %80 : f32 to vector<8x128xf32>
    %82 = arith.mulf %81, %27 : vector<8x128xf32>
    %83 = arith.addf %79, %82 : vector<8x128xf32>
    %c2 = arith.constant 2 : index
    %c0_26 = arith.constant 0 : index
    %84 = memref.load %arg2[%c2, %c0_26] : memref<6x4xf32, #tpu.memory_space<smem>>
    %85 = vector.broadcast %84 : f32 to vector<8x128xf32>
    %86 = arith.mulf %85, %66 : vector<8x128xf32>
    %87 = arith.addf %83, %86 : vector<8x128xf32>
    %c3 = arith.constant 3 : index
    %c0_27 = arith.constant 0 : index
    %88 = memref.load %arg2[%c3, %c0_27] : memref<6x4xf32, #tpu.memory_space<smem>>
    %89 = vector.broadcast %88 : f32 to vector<8x128xf32>
    %90 = arith.mulf %89, %71 : vector<8x128xf32>
    %91 = arith.addf %87, %90 : vector<8x128xf32>
    %c4 = arith.constant 4 : index
    %c0_28 = arith.constant 0 : index
    %92 = memref.load %arg2[%c4, %c0_28] : memref<6x4xf32, #tpu.memory_space<smem>>
    %93 = vector.broadcast %92 : f32 to vector<8x128xf32>
    %94 = arith.mulf %93, %55 : vector<8x128xf32>
    %95 = arith.addf %91, %94 : vector<8x128xf32>
    %c5 = arith.constant 5 : index
    %c0_29 = arith.constant 0 : index
    %96 = memref.load %arg2[%c5, %c0_29] : memref<6x4xf32, #tpu.memory_space<smem>>
    %97 = vector.broadcast %96 : f32 to vector<8x128xf32>
    %98 = arith.mulf %97, %76 : vector<8x128xf32>
    %99 = arith.addf %95, %98 : vector<8x128xf32>
    %c0_30 = arith.constant 0 : index
    %100 = memref.load %arg3[%c0_30] : memref<4xf32, #tpu.memory_space<smem>>
    %101 = vector.broadcast %100 : f32 to vector<8x128xf32>
    %102 = arith.addf %99, %101 : vector<8x128xf32>
    %103 = vector.shape_cast %102 : vector<8x128xf32> to vector<1x8x128xf32>
    %cst_31 = arith.constant dense<0.000000e+00> : vector<1xf32>
    %104 = vector.multi_reduction <add>, %103, %cst_31 [1, 2] : vector<1x8x128xf32> to vector<1xf32>
    %105 = vector.shape_cast %104 : vector<1xf32> to vector<1x1x1xf32>
    %106 = vector.extract %105[0, 0, 0] : f32 from vector<1x1x1xf32>
    %107 = vector.broadcast %106 : f32 to vector<1x1xf32>
    %cst_32 = arith.constant 1.024000e+03 : f32
    %108 = vector.broadcast %cst_32 : f32 to vector<1x1xf32>
    %109 = arith.divf %107, %108 : vector<1x1xf32>
    %110 = arith.mulf %102, %102 : vector<8x128xf32>
    %111 = vector.shape_cast %110 : vector<8x128xf32> to vector<1x8x128xf32>
    %cst_33 = arith.constant dense<0.000000e+00> : vector<1xf32>
    %112 = vector.multi_reduction <add>, %111, %cst_33 [1, 2] : vector<1x8x128xf32> to vector<1xf32>
    %113 = vector.shape_cast %112 : vector<1xf32> to vector<1x1x1xf32>
    %114 = vector.extract %113[0, 0, 0] : f32 from vector<1x1x1xf32>
    %115 = vector.broadcast %114 : f32 to vector<1x1xf32>
    %cst_34 = arith.constant 1.024000e+03 : f32
    %116 = vector.broadcast %cst_34 : f32 to vector<1x1xf32>
    %117 = arith.divf %115, %116 : vector<1x1xf32>
    %118 = arith.mulf %109, %109 : vector<1x1xf32>
    %119 = arith.subf %117, %118 : vector<1x1xf32>
    %cst_35 = arith.constant 0.000000e+00 : f32
    %120 = vector.broadcast %cst_35 : f32 to vector<1x1xf32>
    %121 = arith.maximumf %119, %120 : vector<1x1xf32>
    %122 = vector.broadcast %109 : vector<1x1xf32> to vector<8x128xf32>
    %123 = arith.subf %102, %122 : vector<8x128xf32>
    %cst_36 = arith.constant 9.99999974E-6 : f32
    %124 = vector.broadcast %cst_36 : f32 to vector<1x1xf32>
    %125 = arith.addf %121, %124 : vector<1x1xf32>
    %126 = math.rsqrt %125 : vector<1x1xf32>
    %127 = vector.broadcast %126 : vector<1x1xf32> to vector<8x128xf32>
    %128 = arith.mulf %123, %127 : vector<8x128xf32>
    %cst_37 = arith.constant 0.000000e+00 : f32
    %129 = vector.broadcast %cst_37 : f32 to vector<8x128xf32>
    %130 = arith.maximumf %128, %129 : vector<8x128xf32>
    %c0_38 = arith.constant 0 : index
    %c1_39 = arith.constant 1 : index
    %131 = memref.load %arg2[%c0_38, %c1_39] : memref<6x4xf32, #tpu.memory_space<smem>>
    %132 = vector.broadcast %131 : f32 to vector<8x128xf32>
    %133 = arith.mulf %132, %61 : vector<8x128xf32>
    %c1_40 = arith.constant 1 : index
    %c1_41 = arith.constant 1 : index
    %134 = memref.load %arg2[%c1_40, %c1_41] : memref<6x4xf32, #tpu.memory_space<smem>>
    %135 = vector.broadcast %134 : f32 to vector<8x128xf32>
    %136 = arith.mulf %135, %27 : vector<8x128xf32>
    %137 = arith.addf %133, %136 : vector<8x128xf32>
    %c2_42 = arith.constant 2 : index
    %c1_43 = arith.constant 1 : index
    %138 = memref.load %arg2[%c2_42, %c1_43] : memref<6x4xf32, #tpu.memory_space<smem>>
    %139 = vector.broadcast %138 : f32 to vector<8x128xf32>
    %140 = arith.mulf %139, %66 : vector<8x128xf32>
    %141 = arith.addf %137, %140 : vector<8x128xf32>
    %c3_44 = arith.constant 3 : index
    %c1_45 = arith.constant 1 : index
    %142 = memref.load %arg2[%c3_44, %c1_45] : memref<6x4xf32, #tpu.memory_space<smem>>
    %143 = vector.broadcast %142 : f32 to vector<8x128xf32>
    %144 = arith.mulf %143, %71 : vector<8x128xf32>
    %145 = arith.addf %141, %144 : vector<8x128xf32>
    %c4_46 = arith.constant 4 : index
    %c1_47 = arith.constant 1 : index
    %146 = memref.load %arg2[%c4_46, %c1_47] : memref<6x4xf32, #tpu.memory_space<smem>>
    %147 = vector.broadcast %146 : f32 to vector<8x128xf32>
    %148 = arith.mulf %147, %55 : vector<8x128xf32>
    %149 = arith.addf %145, %148 : vector<8x128xf32>
    %c5_48 = arith.constant 5 : index
    %c1_49 = arith.constant 1 : index
    %150 = memref.load %arg2[%c5_48, %c1_49] : memref<6x4xf32, #tpu.memory_space<smem>>
    %151 = vector.broadcast %150 : f32 to vector<8x128xf32>
    %152 = arith.mulf %151, %76 : vector<8x128xf32>
    %153 = arith.addf %149, %152 : vector<8x128xf32>
    %c1_50 = arith.constant 1 : index
    %154 = memref.load %arg3[%c1_50] : memref<4xf32, #tpu.memory_space<smem>>
    %155 = vector.broadcast %154 : f32 to vector<8x128xf32>
    %156 = arith.addf %153, %155 : vector<8x128xf32>
    %157 = vector.shape_cast %156 : vector<8x128xf32> to vector<1x8x128xf32>
    %cst_51 = arith.constant dense<0.000000e+00> : vector<1xf32>
    %158 = vector.multi_reduction <add>, %157, %cst_51 [1, 2] : vector<1x8x128xf32> to vector<1xf32>
    %159 = vector.shape_cast %158 : vector<1xf32> to vector<1x1x1xf32>
    %160 = vector.extract %159[0, 0, 0] : f32 from vector<1x1x1xf32>
    %161 = vector.broadcast %160 : f32 to vector<1x1xf32>
    %cst_52 = arith.constant 1.024000e+03 : f32
    %162 = vector.broadcast %cst_52 : f32 to vector<1x1xf32>
    %163 = arith.divf %161, %162 : vector<1x1xf32>
    %164 = arith.mulf %156, %156 : vector<8x128xf32>
    %165 = vector.shape_cast %164 : vector<8x128xf32> to vector<1x8x128xf32>
    %cst_53 = arith.constant dense<0.000000e+00> : vector<1xf32>
    %166 = vector.multi_reduction <add>, %165, %cst_53 [1, 2] : vector<1x8x128xf32> to vector<1xf32>
    %167 = vector.shape_cast %166 : vector<1xf32> to vector<1x1x1xf32>
    %168 = vector.extract %167[0, 0, 0] : f32 from vector<1x1x1xf32>
    %169 = vector.broadcast %168 : f32 to vector<1x1xf32>
    %cst_54 = arith.constant 1.024000e+03 : f32
    %170 = vector.broadcast %cst_54 : f32 to vector<1x1xf32>
    %171 = arith.divf %169, %170 : vector<1x1xf32>
    %172 = arith.mulf %163, %163 : vector<1x1xf32>
    %173 = arith.subf %171, %172 : vector<1x1xf32>
    %cst_55 = arith.constant 0.000000e+00 : f32
    %174 = vector.broadcast %cst_55 : f32 to vector<1x1xf32>
    %175 = arith.maximumf %173, %174 : vector<1x1xf32>
    %176 = vector.broadcast %163 : vector<1x1xf32> to vector<8x128xf32>
    %177 = arith.subf %156, %176 : vector<8x128xf32>
    %cst_56 = arith.constant 9.99999974E-6 : f32
    %178 = vector.broadcast %cst_56 : f32 to vector<1x1xf32>
    %179 = arith.addf %175, %178 : vector<1x1xf32>
    %180 = math.rsqrt %179 : vector<1x1xf32>
    %181 = vector.broadcast %180 : vector<1x1xf32> to vector<8x128xf32>
    %182 = arith.mulf %177, %181 : vector<8x128xf32>
    %cst_57 = arith.constant 0.000000e+00 : f32
    %183 = vector.broadcast %cst_57 : f32 to vector<8x128xf32>
    %184 = arith.maximumf %182, %183 : vector<8x128xf32>
    %c0_58 = arith.constant 0 : index
    %c2_59 = arith.constant 2 : index
    %185 = memref.load %arg2[%c0_58, %c2_59] : memref<6x4xf32, #tpu.memory_space<smem>>
    %186 = vector.broadcast %185 : f32 to vector<8x128xf32>
    %187 = arith.mulf %186, %61 : vector<8x128xf32>
    %c1_60 = arith.constant 1 : index
    %c2_61 = arith.constant 2 : index
    %188 = memref.load %arg2[%c1_60, %c2_61] : memref<6x4xf32, #tpu.memory_space<smem>>
    %189 = vector.broadcast %188 : f32 to vector<8x128xf32>
    %190 = arith.mulf %189, %27 : vector<8x128xf32>
    %191 = arith.addf %187, %190 : vector<8x128xf32>
    %c2_62 = arith.constant 2 : index
    %c2_63 = arith.constant 2 : index
    %192 = memref.load %arg2[%c2_62, %c2_63] : memref<6x4xf32, #tpu.memory_space<smem>>
    %193 = vector.broadcast %192 : f32 to vector<8x128xf32>
    %194 = arith.mulf %193, %66 : vector<8x128xf32>
    %195 = arith.addf %191, %194 : vector<8x128xf32>
    %c3_64 = arith.constant 3 : index
    %c2_65 = arith.constant 2 : index
    %196 = memref.load %arg2[%c3_64, %c2_65] : memref<6x4xf32, #tpu.memory_space<smem>>
    %197 = vector.broadcast %196 : f32 to vector<8x128xf32>
    %198 = arith.mulf %197, %71 : vector<8x128xf32>
    %199 = arith.addf %195, %198 : vector<8x128xf32>
    %c4_66 = arith.constant 4 : index
    %c2_67 = arith.constant 2 : index
    %200 = memref.load %arg2[%c4_66, %c2_67] : memref<6x4xf32, #tpu.memory_space<smem>>
    %201 = vector.broadcast %200 : f32 to vector<8x128xf32>
    %202 = arith.mulf %201, %55 : vector<8x128xf32>
    %203 = arith.addf %199, %202 : vector<8x128xf32>
    %c5_68 = arith.constant 5 : index
    %c2_69 = arith.constant 2 : index
    %204 = memref.load %arg2[%c5_68, %c2_69] : memref<6x4xf32, #tpu.memory_space<smem>>
    %205 = vector.broadcast %204 : f32 to vector<8x128xf32>
    %206 = arith.mulf %205, %76 : vector<8x128xf32>
    %207 = arith.addf %203, %206 : vector<8x128xf32>
    %c2_70 = arith.constant 2 : index
    %208 = memref.load %arg3[%c2_70] : memref<4xf32, #tpu.memory_space<smem>>
    %209 = vector.broadcast %208 : f32 to vector<8x128xf32>
    %210 = arith.addf %207, %209 : vector<8x128xf32>
    %211 = vector.shape_cast %210 : vector<8x128xf32> to vector<1x8x128xf32>
    %cst_71 = arith.constant dense<0.000000e+00> : vector<1xf32>
    %212 = vector.multi_reduction <add>, %211, %cst_71 [1, 2] : vector<1x8x128xf32> to vector<1xf32>
    %213 = vector.shape_cast %212 : vector<1xf32> to vector<1x1x1xf32>
    %214 = vector.extract %213[0, 0, 0] : f32 from vector<1x1x1xf32>
    %215 = vector.broadcast %214 : f32 to vector<1x1xf32>
    %cst_72 = arith.constant 1.024000e+03 : f32
    %216 = vector.broadcast %cst_72 : f32 to vector<1x1xf32>
    %217 = arith.divf %215, %216 : vector<1x1xf32>
    %218 = arith.mulf %210, %210 : vector<8x128xf32>
    %219 = vector.shape_cast %218 : vector<8x128xf32> to vector<1x8x128xf32>
    %cst_73 = arith.constant dense<0.000000e+00> : vector<1xf32>
    %220 = vector.multi_reduction <add>, %219, %cst_73 [1, 2] : vector<1x8x128xf32> to vector<1xf32>
    %221 = vector.shape_cast %220 : vector<1xf32> to vector<1x1x1xf32>
    %222 = vector.extract %221[0, 0, 0] : f32 from vector<1x1x1xf32>
    %223 = vector.broadcast %222 : f32 to vector<1x1xf32>
    %cst_74 = arith.constant 1.024000e+03 : f32
    %224 = vector.broadcast %cst_74 : f32 to vector<1x1xf32>
    %225 = arith.divf %223, %224 : vector<1x1xf32>
    %226 = arith.mulf %217, %217 : vector<1x1xf32>
    %227 = arith.subf %225, %226 : vector<1x1xf32>
    %cst_75 = arith.constant 0.000000e+00 : f32
    %228 = vector.broadcast %cst_75 : f32 to vector<1x1xf32>
    %229 = arith.maximumf %227, %228 : vector<1x1xf32>
    %230 = vector.broadcast %217 : vector<1x1xf32> to vector<8x128xf32>
    %231 = arith.subf %210, %230 : vector<8x128xf32>
    %cst_76 = arith.constant 9.99999974E-6 : f32
    %232 = vector.broadcast %cst_76 : f32 to vector<1x1xf32>
    %233 = arith.addf %229, %232 : vector<1x1xf32>
    %234 = math.rsqrt %233 : vector<1x1xf32>
    %235 = vector.broadcast %234 : vector<1x1xf32> to vector<8x128xf32>
    %236 = arith.mulf %231, %235 : vector<8x128xf32>
    %cst_77 = arith.constant 0.000000e+00 : f32
    %237 = vector.broadcast %cst_77 : f32 to vector<8x128xf32>
    %238 = arith.maximumf %236, %237 : vector<8x128xf32>
    %c0_78 = arith.constant 0 : index
    %c3_79 = arith.constant 3 : index
    %239 = memref.load %arg2[%c0_78, %c3_79] : memref<6x4xf32, #tpu.memory_space<smem>>
    %240 = vector.broadcast %239 : f32 to vector<8x128xf32>
    %241 = arith.mulf %240, %61 : vector<8x128xf32>
    %c1_80 = arith.constant 1 : index
    %c3_81 = arith.constant 3 : index
    %242 = memref.load %arg2[%c1_80, %c3_81] : memref<6x4xf32, #tpu.memory_space<smem>>
    %243 = vector.broadcast %242 : f32 to vector<8x128xf32>
    %244 = arith.mulf %243, %27 : vector<8x128xf32>
    %245 = arith.addf %241, %244 : vector<8x128xf32>
    %c2_82 = arith.constant 2 : index
    %c3_83 = arith.constant 3 : index
    %246 = memref.load %arg2[%c2_82, %c3_83] : memref<6x4xf32, #tpu.memory_space<smem>>
    %247 = vector.broadcast %246 : f32 to vector<8x128xf32>
    %248 = arith.mulf %247, %66 : vector<8x128xf32>
    %249 = arith.addf %245, %248 : vector<8x128xf32>
    %c3_84 = arith.constant 3 : index
    %c3_85 = arith.constant 3 : index
    %250 = memref.load %arg2[%c3_84, %c3_85] : memref<6x4xf32, #tpu.memory_space<smem>>
    %251 = vector.broadcast %250 : f32 to vector<8x128xf32>
    %252 = arith.mulf %251, %71 : vector<8x128xf32>
    %253 = arith.addf %249, %252 : vector<8x128xf32>
    %c4_86 = arith.constant 4 : index
    %c3_87 = arith.constant 3 : index
    %254 = memref.load %arg2[%c4_86, %c3_87] : memref<6x4xf32, #tpu.memory_space<smem>>
    %255 = vector.broadcast %254 : f32 to vector<8x128xf32>
    %256 = arith.mulf %255, %55 : vector<8x128xf32>
    %257 = arith.addf %253, %256 : vector<8x128xf32>
    %c5_88 = arith.constant 5 : index
    %c3_89 = arith.constant 3 : index
    %258 = memref.load %arg2[%c5_88, %c3_89] : memref<6x4xf32, #tpu.memory_space<smem>>
    %259 = vector.broadcast %258 : f32 to vector<8x128xf32>
    %260 = arith.mulf %259, %76 : vector<8x128xf32>
    %261 = arith.addf %257, %260 : vector<8x128xf32>
    %c3_90 = arith.constant 3 : index
    %262 = memref.load %arg3[%c3_90] : memref<4xf32, #tpu.memory_space<smem>>
    %263 = vector.broadcast %262 : f32 to vector<8x128xf32>
    %264 = arith.addf %261, %263 : vector<8x128xf32>
    %265 = vector.shape_cast %264 : vector<8x128xf32> to vector<1x8x128xf32>
    %cst_91 = arith.constant dense<0.000000e+00> : vector<1xf32>
    %266 = vector.multi_reduction <add>, %265, %cst_91 [1, 2] : vector<1x8x128xf32> to vector<1xf32>
    %267 = vector.shape_cast %266 : vector<1xf32> to vector<1x1x1xf32>
    %268 = vector.extract %267[0, 0, 0] : f32 from vector<1x1x1xf32>
    %269 = vector.broadcast %268 : f32 to vector<1x1xf32>
    %cst_92 = arith.constant 1.024000e+03 : f32
    %270 = vector.broadcast %cst_92 : f32 to vector<1x1xf32>
    %271 = arith.divf %269, %270 : vector<1x1xf32>
    %272 = arith.mulf %264, %264 : vector<8x128xf32>
    %273 = vector.shape_cast %272 : vector<8x128xf32> to vector<1x8x128xf32>
    %cst_93 = arith.constant dense<0.000000e+00> : vector<1xf32>
    %274 = vector.multi_reduction <add>, %273, %cst_93 [1, 2] : vector<1x8x128xf32> to vector<1xf32>
    %275 = vector.shape_cast %274 : vector<1xf32> to vector<1x1x1xf32>
    %276 = vector.extract %275[0, 0, 0] : f32 from vector<1x1x1xf32>
    %277 = vector.broadcast %276 : f32 to vector<1x1xf32>
    %cst_94 = arith.constant 1.024000e+03 : f32
    %278 = vector.broadcast %cst_94 : f32 to vector<1x1xf32>
    %279 = arith.divf %277, %278 : vector<1x1xf32>
    %280 = arith.mulf %271, %271 : vector<1x1xf32>
    %281 = arith.subf %279, %280 : vector<1x1xf32>
    %cst_95 = arith.constant 0.000000e+00 : f32
    %282 = vector.broadcast %cst_95 : f32 to vector<1x1xf32>
    %283 = arith.maximumf %281, %282 : vector<1x1xf32>
    %284 = vector.broadcast %271 : vector<1x1xf32> to vector<8x128xf32>
    %285 = arith.subf %264, %284 : vector<8x128xf32>
    %cst_96 = arith.constant 9.99999974E-6 : f32
    %286 = vector.broadcast %cst_96 : f32 to vector<1x1xf32>
    %287 = arith.addf %283, %286 : vector<1x1xf32>
    %288 = math.rsqrt %287 : vector<1x1xf32>
    %289 = vector.broadcast %288 : vector<1x1xf32> to vector<8x128xf32>
    %290 = arith.mulf %285, %289 : vector<8x128xf32>
    %cst_97 = arith.constant 0.000000e+00 : f32
    %291 = vector.broadcast %cst_97 : f32 to vector<8x128xf32>
    %292 = arith.maximumf %290, %291 : vector<8x128xf32>
    %293 = tpu.concatenate %130, %184, %238, %292 in 1 : vector<8x128xf32>, vector<8x128xf32>, vector<8x128xf32>, vector<8x128xf32> -> vector<8x512xf32>
    %c0_98 = arith.constant 0 : index
    %c0_99 = arith.constant 0 : index
    %294 = vector.load %arg5[%c0_98, %c0_99] : memref<1x128xf32, #tpu.memory_space<vmem>>, vector<1x128xf32>
    %c0_100 = arith.constant 0 : index
    %c0_101 = arith.constant 0 : index
    %295 = vector.load %arg4[%c0_100, %c0_101] : memref<512x128xf32, #tpu.memory_space<vmem>>, vector<512x128xf32>
    %cst_102 = arith.constant dense<0.000000e+00> : vector<8x128xf32>
    %296 = tpu.matmul %293, %295, %cst_102 {dimension_numbers = #tpu.dot_dimension_numbers<[1], [0], [0], [1], [0, 0, 1, 1], [], []>} : vector<8x512xf32>, vector<512x128xf32>, vector<8x128xf32> -> vector<8x128xf32>
    %297 = vector.broadcast %294 : vector<1x128xf32> to vector<8x128xf32>
    %298 = arith.addf %297, %296 : vector<8x128xf32>
    %cst_103 = arith.constant dense<0.000000e+00> : vector<128xf32>
    %299 = vector.multi_reduction <add>, %298, %cst_103 [0] : vector<8x128xf32> to vector<128xf32>
    %300 = vector.shape_cast %299 : vector<128xf32> to vector<1x128xf32>
    %cst_104 = arith.constant 8.000000e+00 : f32
    %301 = vector.broadcast %cst_104 : f32 to vector<1x128xf32>
    %302 = arith.divf %300, %301 : vector<1x128xf32>
    %303 = arith.mulf %298, %298 : vector<8x128xf32>
    %cst_105 = arith.constant dense<0.000000e+00> : vector<128xf32>
    %304 = vector.multi_reduction <add>, %303, %cst_105 [0] : vector<8x128xf32> to vector<128xf32>
    %305 = vector.shape_cast %304 : vector<128xf32> to vector<1x128xf32>
    %cst_106 = arith.constant 8.000000e+00 : f32
    %306 = vector.broadcast %cst_106 : f32 to vector<1x128xf32>
    %307 = arith.divf %305, %306 : vector<1x128xf32>
    %308 = arith.mulf %302, %302 : vector<1x128xf32>
    %309 = arith.subf %307, %308 : vector<1x128xf32>
    %cst_107 = arith.constant 0.000000e+00 : f32
    %310 = vector.broadcast %cst_107 : f32 to vector<1x128xf32>
    %311 = arith.maximumf %309, %310 : vector<1x128xf32>
    %312 = vector.broadcast %302 : vector<1x128xf32> to vector<8x128xf32>
    %313 = arith.subf %298, %312 : vector<8x128xf32>
    %cst_108 = arith.constant 9.99999974E-6 : f32
    %314 = vector.broadcast %cst_108 : f32 to vector<1x128xf32>
    %315 = arith.addf %311, %314 : vector<1x128xf32>
    %316 = math.rsqrt %315 : vector<1x128xf32>
    %317 = vector.broadcast %316 : vector<1x128xf32> to vector<8x128xf32>
    %318 = arith.mulf %313, %317 : vector<8x128xf32>
    %cst_109 = arith.constant 0.000000e+00 : f32
    %319 = vector.broadcast %cst_109 : f32 to vector<8x128xf32>
    %320 = arith.maximumf %318, %319 : vector<8x128xf32>
    %c0_110 = arith.constant 0 : index
    %c0_111 = arith.constant 0 : index
    %321 = vector.load %arg6[%c0_110, %c0_111] : memref<8x128xf32, #tpu.memory_space<vmem>>, vector<8x128xf32>
    tpu.vector_store %arg6[%c0_110, %c0_111], %320 {strides = array<i32>} : memref<8x128xf32, #tpu.memory_space<vmem>>, vector<8x128xf32>,
    return
  }
}

module attributes {stable_mosaic.version = 11 : i64} {
  func.func @_score_kernel(%arg0: i32, %arg1: memref<8x128xf32, #tpu.memory_space<vmem>>, %arg2: memref<1024x128xf32, #tpu.memory_space<vmem>>, %arg3: memref<8x1024xf32, #tpu.memory_space<vmem>>) attributes {dimension_semantics = [#tpu.dimension_semantics<parallel>], iteration_bounds = array<i64: 2>, scalar_prefetch = 0 : i64, scratch_operands = 0 : i64, tpu.core_type = #tpu.core_type<tc>, window_params = [{pipeline_mode = #tpu.pipeline_mode<synchronous>, transform_indices = @transform_0, window_bounds = array<i64: 8, 128>}, {transform_indices = @transform_1, window_bounds = array<i64: 1024, 128>}, {transform_indices = @transform_2, window_bounds = array<i64: 8, 1024>}]} {
    %c0 = arith.constant 0 : index
    %c0_0 = arith.constant 0 : index
    %0 = vector.load %arg2[%c0, %c0_0] : memref<1024x128xf32, #tpu.memory_space<vmem>>, vector<1024x128xf32>
    %1 = math.tanh %0 : vector<1024x128xf32>
    %c0_1 = arith.constant 0 : index
    %c0_2 = arith.constant 0 : index
    %2 = vector.load %arg1[%c0_1, %c0_2] : memref<8x128xf32, #tpu.memory_space<vmem>>, vector<8x128xf32>
    %cst = arith.constant dense<0.000000e+00> : vector<8x1024xf32>
    %3 = tpu.matmul %2, %1, %cst {dimension_numbers = #tpu.dot_dimension_numbers<[1], [1], [0], [0], [0, 0, 1, 0], [], []>} : vector<8x128xf32>, vector<1024x128xf32>, vector<8x1024xf32> -> vector<8x1024xf32>
    %c0_3 = arith.constant 0 : index
    %c0_4 = arith.constant 0 : index
    %4 = vector.load %arg3[%c0_3, %c0_4] : memref<8x1024xf32, #tpu.memory_space<vmem>>, vector<8x1024xf32>
    tpu.vector_store %arg3[%c0_3, %c0_4], %3 {strides = array<i32>} : memref<8x1024xf32, #tpu.memory_space<vmem>>, vector<8x1024xf32>,
    return
  }
  func.func @transform_0(%arg0: i32) -> (i32, i32) {
    %c0_i32 = arith.constant 0 : i32
    %c0_i32_0 = arith.constant 0 : i32
    %c0_i32_1 = arith.constant 0 : i32
    return %c0_i32, %c0_i32_0 : i32, i32
  }
  func.func @transform_1(%arg0: i32) -> (i32, i32) {
    %c0_i32 = arith.constant 0 : i32
    %c0_i32_0 = arith.constant 0 : i32
    return %arg0, %c0_i32 : i32, i32
  }
  func.func @transform_2(%arg0: i32) -> (i32, i32) {
    %c0_i32 = arith.constant 0 : i32
    %c0_i32_0 = arith.constant 0 : i32
    return %c0_i32, %arg0 : i32, i32
  }
}

</mosaic_0001>

<bundles_post_ra>
// kernel: _timestep.2
= control target key start
LH: loop header
LB: loop body
LE: loop exit
PB: predicated region body
PF: predicated region fallthrough
CT: control target
= control target key end

     0   :  { %11 = vsyncpa [#allocation3], 0  ;;  %s1164_s0 = inlined_call_operand.vmem [shape: f32[8,128], index: 0, kind: input, shape index: {}]   ;;  %s1165_s1 = inlined_call_operand.vmem [shape: f32[8,128], index: 1, kind: input, shape index: {}]   ;;  %s1166_s2 = inlined_call_operand.vmem [shape: f32[6,4], index: 2, kind: input, shape index: {}]   ;;  %s1167_s3 = inlined_call_operand.vmem [shape: f32[4], index: 3, kind: input, shape index: {}]   ;;  %s1168_s4 = inlined_call_operand.vmem [shape: f32[512,128], index: 4, kind: input, shape index: {}]   ;;  %s1169_s5 = inlined_call_operand.vmem [shape: f32[1,128], index: 5, kind: input, shape index: {}]   ;;  %s1170_s6 = inlined_call_operand.vmem [shape: f32[8,128], index: 6, kind: output, shape index: {}]  }
   0x1   :  { %s23_s23 = sshll.u32 %s1166_s2, 4  ;;  %s24_s23 = int_to_ptr.vmem [resolvable:$true] %s23_s23 }
   0x2   :  { %12 = vsyncpa [#allocation5], 0  ;;  %s33_s26 = sshll.u32 %s1167_s3, 4  ;;  %s743_s27 = scalar_lea.vmem %s24_s23, 128  ;;  %s34_s26 = int_to_ptr.vmem [resolvable:$true] %s33_s26 }
   0x3   :  { %p744_p0 = scmp.ne.s32.totalorder %s24_s23, %s743_s27  ;;  %p748_p1 = scmp.lt.s32.totalorder %s24_s23, %s24_s23 }
   0x4   :  { %p749_p2 = scmp.lt.s32.totalorder %s743_s27, %s743_s27 }
   0x6   :  { %p750_p3 = por %p749_p2, %p748_p1 }
   0x8   :  { %p751_p4 = pnand %p750_p3, %p744_p0 }
   0xa   :  { %754 = shalt.err (!%p751_p4)
}
   0xb   :  { %s771_s28 = smov [#allocation2]   ;;  %s755_s29 = scalar_lea.vmem %s34_s26, 16 }
   0xc   :  { %26 = dma.vmem_to_smem %s24_s23, 128, %s771_s28, [#allocation3]  }
   0xd   :  { %p756_p5 = scmp.ne.s32.totalorder %s34_s26, %s755_s29  ;;  %p760_p6 = scmp.lt.s32.totalorder %s34_s26, %s34_s26 }
   0xe   :  { %p761_p7 = scmp.lt.s32.totalorder %s755_s29, %s755_s29 }
  0x10   :  { %p762_p8 = por %p761_p7, %p760_p6 }
  0x12   :  { %p763_p9 = pnand %p762_p8, %p756_p5 }
  0x14   :  { %766 = shalt.err (!%p763_p9)
}
  0x15   :  { %s772_s2 = smov [#allocation4]  }
  0x16   :  { %36 = dma.vmem_to_smem %s34_s26, 16, %s772_s2, [#allocation5]  }
  0x17   :  { %767 = dma.done.wait [#allocation3], 128  }
  0x18   :  { %768 = vsyncadd [#allocation3], 4294967168 }
  0x19   :  { %769 = dma.done.wait [#allocation5], 16  }
  0x1a   :  { %770 = vsyncadd [#allocation5], 4294967280 }
  0x1b   :  { %47 = sfence }
  0x1c   :  { %v81_v0 = vld [vmem:[%s1165_s1] sm:$0xff]  ;;  %s773_s11 = smov 127   ;;  %s774_s12 = smov 1   ;;  %v113_v56 = vlaneseq }
  0x1d   :  { %v48_v1 = vld [vmem:[%s1164_s0] sm:$0xff]  ;;  %725 = vtanh.f32 %v81_v0  ;;  %s842_s13 = sld [smem:[#allocation2 + $0x80]] }
  0x1e   :  { %727 = vtanh.f32 %v48_v1  ;;  %s844_s14 = sld [smem:[#allocation2 + $0x81]]  ;;  %v886_v57 = vand.u32 127, %v113_v56 }
  0x1f   :  { %s846_s15 = sld [smem:[#allocation2 + $0x82]] }
  0x20   :  { %s848_s16 = sld [smem:[#allocation2 + $0x83]]  ;;  %vm119_vm0 = vcmp.eq.s32.totalorder %v886_v57, 127  ;;  %vm115_vm1 = vcmp.eq.s32.totalorder %v886_v57, 0 }
  0x21   :  { %s850_s17 = sld [smem:[#allocation2 + $0x202]] }
  0x22   :  { %s852_s18 = sld [smem:[#allocation2 + $0x203]] }
  0x23   :  { %s854_s19 = sld [smem:[#allocation2 + $0x200]]  ;;  %v133_v58 = vstv %s842_s13 }
  0x24   :  { %s856_s20 = sld [smem:[#allocation2 + $0x201]]  ;;  %v190_v59 = vstv %s844_s14 }
  0x25   :  { %s858_s21 = sld [smem:[#allocation2 + $0x100]]  ;;  %v247_v60 = vstv %s846_s15 }
  0x26   :  { %s860_s22 = sld [smem:[#allocation2 + $0x101]]  ;;  %v304_v61 = vstv %s848_s16 }
  0x27   :  { %s862_s23 = sld [smem:[#allocation2 + $0x102]]  ;;  %v259_v62 = vstv %s850_s17 }
  0x28   :  { %s864_s24 = sld [smem:[#allocation2 + $0x103]]  ;;  %v316_v63 = vstv %s852_s18 }
  0x29   :  { %s866_s25 = sld [smem:[#allocation2]]  ;;  %v145_v0 = vstv %s854_s19 }
  0x2a   :  { %v822_v2 = vpop.eup %725  ;;  %s868_s26 = sld [smem:[#allocation2 + $0x1]] }
  0x2b   :  { %v824_v3 = vpop.eup %727  ;;  %83 = vadd.xlane.f32.xlu1 %v822_v2  ;;  %v94_v4 = vmul.f32 %v822_v2, %v822_v2  ;;  %s870_s27 = sld [smem:[#allocation2 + $0x2]]  ;;  %v137_v1 = vstv %s858_s21 }
  0x2c   :  { %50 = vadd.xlane.f32.xlu0 %v824_v3  ;;  %v62_v5 = vmul.f32 %v824_v3, %v824_v3  ;;  %s872_s28 = sld [smem:[#allocation2 + $0x3]] }
  0x2d   :  { %s874_s29 = sld [smem:[#allocation2 + $0x180]] }
  0x2e   :  { %s876_s2 = sld [smem:[#allocation2 + $0x181]] }
  0x2f   :  { %95 = vadd.xlane.f32.xlu1 %v94_v4  ;;  %s878_s3 = sld [smem:[#allocation2 + $0x182]]  ;;  %v251_v4 = vstv %s862_s23 }
  0x30   :  { %63 = vadd.xlane.f32.xlu0 %v62_v5  ;;  %s880_s30 = sld [smem:[#allocation2 + $0x183]]  ;;  %v308_v5 = vstv %s864_s24 }
  0x31   :  { %s882_s7 = sld [smem:[#allocation2 + $0x280]] }
  0x32   :  { %s884_s8 = sld [smem:[#allocation2 + $0x281]] }
  0xb4   :  { %v84_v6 = vpop.xlane.xlu1 %83 }
  0xb5   :  { %v85_v7 = vrot.slane %v84_v6, 4  ;;  %v51_v8 = vpop.xlane.xlu0 %50 }
  0xb6   :  { %v52_v9 = vrot.slane %v51_v8, 4 }
  0xb7   :  { %v86_v10 = vadd.f32 %v85_v7, %v84_v6  ;;  %v130_v6 = vstv %s866_s25  ;;  %v187_v7 = vstv %s868_s26 }
  0xb8   :  { %v53_v11 = vadd.f32 %v52_v9, %v51_v8  ;;  %v96_v12 = vpop.xlane.xlu1 %95  ;;  %v244_v8 = vstv %s870_s27  ;;  %v301_v9 = vstv %s872_s28 }
  0xb9   :  { %v87_v13 = vrot.slane %v86_v10, 2  ;;  %v97_v14 = vrot.slane %v96_v12, 4  ;;  %v64_v15 = vpop.xlane.xlu0 %63 }
  0xba   :  { %v54_v16 = vrot.slane %v53_v11, 2  ;;  %v65_v17 = vrot.slane %v64_v15, 4 }
  0xbb   :  { %v98_v18 = vadd.f32 %v97_v14, %v96_v12  ;;  %v88_v22 = vadd.f32 %v87_v13, %v86_v10  ;;  %v141_v10 = vstv %s874_s29  ;;  %v198_v13 = vstv %s876_s2 }
  0xbc   :  { %v66_v19 = vadd.f32 %v65_v17, %v64_v15  ;;  %v55_v20 = vadd.f32 %v54_v16, %v53_v11  ;;  %v255_v14 = vstv %s878_s3  ;;  %v312_v15 = vstv %s880_s30 }
  0xbd   :  { %v99_v21 = vrot.slane %v98_v18, 2  ;;  %v89_v28 = vrot.slane %v88_v22, 1  ;;  %v149_v16 = vstv %s882_s7 }
  0xbe   :  { %v67_v23 = vrot.slane %v66_v19, 2  ;;  %v56_v24 = vrot.slane %v55_v20, 1 }
  0xbf   :  { %v100_v25 = vadd.f32 %v99_v21, %v98_v18  ;;  %v90_v33 = vadd.f32 %v89_v28, %v88_v22 }
  0xc0   :  { %v57_v26 = vadd.f32 %v56_v24, %v55_v20  ;;  %v68_v27 = vadd.f32 %v67_v23, %v66_v19  ;;  %v206_v19 = vstv %s884_s8 }
  0xc1   :  { %v101_v29 = vrot.slane %v100_v25, 1 }
  0xc2   :  { %697 = vpush %v57_v26  ;;  %v69_v30 = vrot.slane %v68_v27, 1 }
  0xc3   :  { %v102_v32 = vadd.f32 %v101_v29, %v100_v25 }
  0xc4   :  { %v70_v31 = vadd.f32 %v69_v30, %v68_v27 }
  0xc6   :  { %699 = vpush %v70_v31 }
  0xc7   :  { %701 = vpush %v90_v33 }
  0xc8   :  { %703 = vpush %v102_v32 }
  0xf3   :  { %s698_s0 = spop %697 }
  0xf4   :  { %v59_v34 = vstv %s698_s0  ;;  %s888_s0 = sld [smem:[#allocation2 + $0x282]] }
  0xf5   :  { %v61_v35 = vmul.f32 0.0009765625, %v59_v34 }
  0xf7   :  { %s700_s1 = spop %699  ;;  %v74_v37 = vmul.f32 %v61_v35, %v61_v35  ;;  %v77_v50 = vsub.f32 %v824_v3, %v61_v35  ;;  %v202_v3 = vstv %s856_s20 }
  0xf8   :  { %v72_v36 = vstv %s700_s1  ;;  %s702_s9 = spop %701  ;;  %s896_s1 = sld [smem:[#allocation2 + $0x283]] }
  0xf9   :  { %v73_v38 = vmul.f32 0.0009765625, %v72_v36  ;;  %v92_v39 = vstv %s702_s9  ;;  %s704_s10 = spop %703  ;;  %s927_s9 = sld [smem:[#allocation4]] }
  0xfa   :  { %v93_v40 = vmul.f32 0.0009765625, %v92_v39  ;;  %v104_v41 = vstv %s704_s10  ;;  %v263_v20 = vstv %s888_s0  ;;  %s932_s10 = sld [smem:[#allocation4 + $0x2]] }
  0xfb   :  { %v75_v42 = vsub.f32 %v73_v38, %v74_v37  ;;  %v105_v44 = vmul.f32 0.0009765625, %v104_v41 }
  0xfc   :  { %v106_v43 = vmul.f32 %v93_v40, %v93_v40  ;;  %v109_v54 = vsub.f32 %v822_v2, %v93_v40  ;;  %v194_v2 = vstv %s860_s22 }
  0xfd   :  { %v76_v45 = vmax.f32 %v75_v42, 0.0 }
  0xfe   :  { %v107_v46 = vsub.f32 %v105_v44, %v106_v43  ;;  %v320_v33 = vstv %s896_s1 }
  0xff   :  { %v78_v47 = vadd.f32 1e-05, %v76_v45 }
 0x100   :  { %v108_v48 = vmax.f32 %v107_v46, 0.0 }
 0x101   :  { %729 = vrsqrt.f32 %v78_v47 }
 0x102   :  { %v110_v49 = vadd.f32 1e-05, %v108_v48 }
 0x104   :  { %731 = vrsqrt.f32 %v110_v49 }
 0x10e   :  { %v730_v51 = vpop.eup %729 }
 0x10f   :  { %v833_v52 = vmul.f32 %v730_v51, %v77_v50 }
 0x111   :  { %v732_v53 = vpop.eup %731  ;;  %120 = vrot.lane.b32.xlu1 %v833_v52, %s773_s11  ;;  %116 = vrot.lane.b32.xlu0 %v833_v52, %s774_s12  ;;  %v134_v21 = vmul.f32 %v133_v58, %v833_v52  ;;  %v191_v22 = vmul.f32 %v190_v59, %v833_v52  ;;  %v248_v23 = vmul.f32 %v247_v60, %v833_v52 }
 0x112   :  { %v838_v55 = vmul.f32 %v732_v53, %v109_v54  ;;  %v305_v24 = vmul.f32 %v304_v61, %v833_v52 }
 0x114   :  { %v260_v32 = vmul.f32 %v259_v62, %v838_v55  ;;  %v146_v41 = vmul.f32 %v145_v0, %v838_v55  ;;  %v203_v54 = vmul.f32 %v202_v3, %v838_v55  ;;  %v317_v59 = vmul.f32 %v316_v63, %v838_v55 }
 0x115   :  { %123 = vrot.lane.b32.xlu1 %v838_v55, %s774_s12  ;;  %s625_s12 = sld [smem:[#allocation4 + $0x3]] }
 0x119   :  { %126 = vrot.lane.b32.xlu1 %v838_v55, %s773_s11  ;;  %s611_s11 = sld [smem:[#allocation4 + $0x1]] }
 0x183   :  { %v121_v11 = vpop.permute.xlu1 %120  ;;  %v117_v12 = vpop.permute.xlu0 %116 }
 0x184   :  { %v122_v17 = vsel %vm119_vm0, 0.0, %v121_v11  ;;  %v118_v18 = vsel %vm115_vm1, 0.0, %v117_v12  ;;  %v324_v12 = vstv %s625_s12 }
 0x185   :  { %v131_v25 = vmul.f32 %v130_v6, %v118_v18  ;;  %v188_v26 = vmul.f32 %v187_v7, %v118_v18  ;;  %v245_v27 = vmul.f32 %v244_v8, %v118_v18  ;;  %v302_v28 = vmul.f32 %v301_v9, %v118_v18  ;;  %v389_v18 = vld [vmem:[%s1168_s4 + $0xf8] sm:$0xff] }
 0x186   :  { %v138_v29 = vmul.f32 %v137_v1, %v122_v17  ;;  %v195_v30 = vmul.f32 %v194_v2, %v122_v17  ;;  %v252_v38 = vmul.f32 %v251_v4, %v122_v17  ;;  %v309_v39 = vmul.f32 %v308_v5, %v122_v17  ;;  %627 = vmatprep.subr.mxu0 %v389_v18  ;;  %v407_v18 = vld [vmem:[%s1168_s4 + $0x188] sm:$0xff] }
 0x187   :  { %v124_v31 = vpop.permute.xlu1 %123  ;;  %v135_v34 = vadd.f32 %v134_v21, %v131_v25  ;;  %v192_v35 = vadd.f32 %v191_v22, %v188_v26  ;;  %v249_v36 = vadd.f32 %v248_v23, %v245_v27  ;;  %v306_v37 = vadd.f32 %v305_v24, %v302_v28  ;;  %v372_v21 = vld [vmem:[%s1168_s4 + $0x70] sm:$0xff]  ;;  %v387_v22 = vld [vmem:[%s1168_s4 + $0xe8] sm:$0xff]  ;;  %v386_v24 = vld [vmem:[%s1168_s4 + $0xe0] sm:$0xff] }
 0x188   :  { %v125_v40 = vsel %vm115_vm1, 0.0, %v124_v31  ;;  %v153_v5 = vstv %s927_s9  ;;  %v267_v8 = vstv %s932_s10  ;;  %v371_v23 = vld [vmem:[%s1168_s4 + $0x68] sm:$0xff]  ;;  %v421_v25 = vld [vmem:[%s1168_s4 + $0x1f8] sm:$0xff] }
 0x189   :  { %v139_v42 = vadd.f32 %v138_v29, %v135_v34  ;;  %v142_v43 = vmul.f32 %v141_v10, %v125_v40  ;;  %v196_v44 = vadd.f32 %v195_v30, %v192_v35  ;;  %v199_v45 = vmul.f32 %v198_v13, %v125_v40  ;;  %662 = vmatprep.subr.mxu1 %v421_v25  ;;  %v370_v26 = vld [vmem:[%s1168_s4 + $0x60] sm:$0xff]  ;;  %v405_v27 = vld [vmem:[%s1168_s4 + $0x178] sm:$0xff]  ;;  %v420_v29 = vld [vmem:[%s1168_s4 + $0x1f0] sm:$0xff] }
 0x18a   :  { %v253_v46 = vadd.f32 %v252_v38, %v249_v36  ;;  %v256_v47 = vmul.f32 %v255_v14, %v125_v40  ;;  %v310_v48 = vadd.f32 %v309_v39, %v306_v37  ;;  %v313_v49 = vmul.f32 %v312_v15, %v125_v40  ;;  %663 = vmatpush3.msra.mxu1 %v405_v27  ;;  %v385_v28 = vld [vmem:[%s1168_s4 + $0xd8] sm:$0xff]  ;;  %v404_v31 = vld [vmem:[%s1168_s4 + $0x170] sm:$0xff]  ;;  %v403_v35 = vld [vmem:[%s1168_s4 + $0x168] sm:$0xff] }
 0x18b   :  { %v127_v50 = vpop.permute.xlu1 %126  ;;  %v143_v51 = vadd.f32 %v142_v43, %v139_v42  ;;  %v200_v52 = vadd.f32 %v199_v45, %v196_v44  ;;  %v210_v10 = vstv %s611_s11  ;;  %664 = vmatprep.subr.mxu1 %v420_v29  ;;  %v369_v30 = vld [vmem:[%s1168_s4 + $0x58] sm:$0xff]  ;;  %v368_v34 = vld [vmem:[%s1168_s4 + $0x50] sm:$0xff]  ;;  %v383_v36 = vld [vmem:[%s1168_s4 + $0xc8] sm:$0xff] }
 0x18c   :  { %v128_v53 = vsel %vm119_vm0, 0.0, %v127_v50  ;;  %v257_v56 = vadd.f32 %v256_v47, %v253_v46  ;;  %v314_v58 = vadd.f32 %v313_v49, %v310_v48  ;;  %665 = vmatpush3.msra.mxu1 %v404_v31  ;;  %v418_v37 = vld [vmem:[%s1168_s4 + $0x1e0] sm:$0xff]  ;;  %v367_v38 = vld [vmem:[%s1168_s4 + $0x48] sm:$0xff]  ;;  %v401_v43 = vld [vmem:[%s1168_s4 + $0x158] sm:$0xff] }
 0x18d   :  { %v150_v60 = vmul.f32 %v149_v16, %v128_v53  ;;  %v207_v61 = vmul.f32 %v206_v19, %v128_v53  ;;  %v264_v62 = vmul.f32 %v263_v20, %v128_v53  ;;  %v147_v0 = vadd.f32 %v146_v41, %v143_v51  ;;  %v373_v19 = vld [vmem:[%s1168_s4 + $0x78] sm:$0xff]  ;;  %v388_v20 = vld [vmem:[%s1168_s4 + $0xf0] sm:$0xff]  ;;  %v402_v39 = vld [vmem:[%s1168_s4 + $0x160] sm:$0xff] }
 0x18e   :  { %v204_v1 = vadd.f32 %v203_v54, %v200_v52  ;;  %v261_v2 = vadd.f32 %v260_v32, %v257_v56  ;;  %v318_v4 = vadd.f32 %v317_v59, %v314_v58  ;;  %v321_v6 = vmul.f32 %v320_v33, %v128_v53  ;;  %628 = vmatpush3.msra.mxu0 %v373_v19  ;;  %v384_v32 = vld [vmem:[%s1168_s4 + $0xd0] sm:$0xff]  ;;  %v419_v33 = vld [vmem:[%s1168_s4 + $0x1e8] sm:$0xff]  ;;  %v382_v40 = vld [vmem:[%s1168_s4 + $0xc0] sm:$0xff] }
 0x18f   :  { %v151_v57 = vadd.f32 %v150_v60, %v147_v0  ;;  %629 = vmatprep.subr.mxu0 %v388_v20  ;;  %666 = vmatprep.subr.mxu1 %v419_v33  ;;  %v417_v41 = vld [vmem:[%s1168_s4 + $0x1d8] sm:$0xff]  ;;  %v366_v42 = vld [vmem:[%s1168_s4 + $0x40] sm:$0xff]  ;;  %v416_v45 = vld [vmem:[%s1168_s4 + $0x1d0] sm:$0xff] }
 0x190   :  { %v265_v7 = vadd.f32 %v264_v62, %v261_v2  ;;  %v208_v9 = vadd.f32 %v207_v61, %v204_v1  ;;  %v322_v11 = vadd.f32 %v321_v6, %v318_v4  ;;  %630 = vmatpush3.msra.mxu0 %v372_v21  ;;  %667 = vmatpush3.msra.mxu1 %v403_v35  ;;  %v381_v44 = vld [vmem:[%s1168_s4 + $0xb8] sm:$0xff]  ;;  %v400_v47 = vld [vmem:[%s1168_s4 + $0x150] sm:$0xff]  ;;  %v415_v49 = vld [vmem:[%s1168_s4 + $0x1c8] sm:$0xff] }
 0x191   :  { %v942_v3 = vadd.f32 %v153_v5, %v151_v57  ;;  %631 = vmatprep.subr.mxu0 %v387_v22  ;;  %668 = vmatprep.subr.mxu1 %v418_v37  ;;  %v365_v46 = vld [vmem:[%s1168_s4 + $0x38] sm:$0xff]  ;;  %v380_v48 = vld [vmem:[%s1168_s4 + $0xb0] sm:$0xff]  ;;  %v399_v51 = vld [vmem:[%s1168_s4 + $0x148] sm:$0xff] }
 0x192   :  { %v947_v63 = vadd.f32 %v267_v8, %v265_v7  ;;  %v949_v13 = vadd.f32 %v210_v10, %v208_v9  ;;  %v954_v15 = vadd.f32 %v324_v12, %v322_v11  ;;  %632 = vmatpush3.msra.mxu0 %v371_v23  ;;  %669 = vmatpush3.msra.mxu1 %v402_v39  ;;  %v364_v50 = vld [vmem:[%s1168_s4 + $0x30] sm:$0xff]  ;;  %v379_v52 = vld [vmem:[%s1168_s4 + $0xa8] sm:$0xff]  ;;  %v414_v53 = vld [vmem:[%s1168_s4 + $0x1c0] sm:$0xff] }
 0x193   :  { %155 = vadd.xlane.f32.xlu0 %v942_v3  ;;  %v166_v55 = vmul.f32 %v942_v3, %v942_v3  ;;  %633 = vmatprep.subr.mxu0 %v386_v24  ;;  %v363_v54 = vld [vmem:[%s1168_s4 + $0x28] sm:$0xff]  ;;  %v398_v56 = vld [vmem:[%s1168_s4 + $0x140] sm:$0xff]  ;;  %v413_v59 = vld [vmem:[%s1168_s4 + $0x1b8] sm:$0xff] }
 0x194   :  { %v280_v14 = vmul.f32 %v947_v63, %v947_v63  ;;  %v337_v16 = vmul.f32 %v954_v15, %v954_v15  ;;  %v223_v17 = vmul.f32 %v949_v13, %v949_v13  ;;  %634 = vmatpush3.msra.mxu0 %v370_v26  ;;  %670 = vmatprep.subr.mxu1 %v417_v41  ;;  %v378_v58 = vld [vmem:[%s1168_s4 + $0xa0] sm:$0xff]  ;;  %v397_v61 = vld [vmem:[%s1168_s4 + $0x138] sm:$0xff]  ;;  %v412_v0 = vld [vmem:[%s1168_s4 + $0x1b0] sm:$0xff] }
 0x195   :  { %167 = vadd.xlane.f32.xlu1 %v166_v55  ;;  %635 = vmatprep.subr.mxu0 %v385_v28  ;;  %v362_v60 = vld [vmem:[%s1168_s4 + $0x20] sm:$0xff]  ;;  %v377_v62 = vld [vmem:[%s1168_s4 + $0x98] sm:$0xff]  ;;  %v396_v2 = vld [vmem:[%s1168_s4 + $0x130] sm:$0xff] }
 0x196   :  { %636 = vmatpush3.msra.mxu0 %v369_v30  ;;  %671 = vmatpush3.msra.mxu1 %v401_v43  ;;  %v361_v1 = vld [vmem:[%s1168_s4 + $0x18] sm:$0xff]  ;;  %v376_v4 = vld [vmem:[%s1168_s4 + $0x90] sm:$0xff]  ;;  %v411_v5 = vld [vmem:[%s1168_s4 + $0x1a8] sm:$0xff] }
 0x197   :  { %212 = vadd.xlane.f32.xlu0 %v949_v13  ;;  %637 = vmatprep.subr.mxu0 %v384_v32  ;;  %v360_v6 = vld [vmem:[%s1168_s4 + $0x10] sm:$0xff]  ;;  %v395_v57 = vld [vmem:[%s1168_s4 + $0x128] sm:$0xff]  ;;  %v410_v8 = vld [vmem:[%s1168_s4 + $0x1a0] sm:$0xff] }
 0x198   :  { %638 = vmatpush3.msra.mxu0 %v368_v34  ;;  %672 = vmatprep.subr.mxu1 %v416_v45  ;;  %v375_v7 = vld [vmem:[%s1168_s4 + $0x88] sm:$0xff]  ;;  %v394_v10 = vld [vmem:[%s1168_s4 + $0x120] sm:$0xff]  ;;  %v409_v55 = vld [vmem:[%s1168_s4 + $0x198] sm:$0xff] }
 0x199   :  { %281 = vadd.xlane.f32.xlu1 %v280_v14  ;;  %639 = vmatprep.subr.mxu0 %v383_v36  ;;  %v359_v9 = vld [vmem:[%s1168_s4 + $0x8] sm:$0xff]  ;;  %v374_v11 = vld [vmem:[%s1168_s4 + $0x80] sm:$0xff]  ;;  %v393_v14 = vld [vmem:[%s1168_s4 + $0x118] sm:$0xff] }
 0x19a   :  { %640 = vmatpush3.msra.mxu0 %v367_v38  ;;  %673 = vmatpush3.msra.mxu1 %v400_v47  ;;  %v358_v12 = vld [vmem:[%s1168_s4] sm:$0xff]  ;;  %v391_v19 = vld [vmem:[%s1168_s4 + $0x108] sm:$0xff] }
 0x19b   :  { %269 = vadd.xlane.f32.xlu0 %v947_v63  ;;  %641 = vmatprep.subr.mxu0 %v382_v40  ;;  %v406_v20 = vld [vmem:[%s1168_s4 + $0x180] sm:$0xff] }
 0x19c   :  { %642 = vmatpush3.msra.mxu0 %v366_v42  ;;  %674 = vmatprep.subr.mxu1 %v415_v49  ;;  %v390_v21 = vld [vmem:[%s1168_s4 + $0x100] sm:$0xff] }
 0x19d   :  { %338 = vadd.xlane.f32.xlu1 %v337_v16  ;;  %643 = vmatprep.subr.mxu0 %v381_v44  ;;  %v408_v16 = vld [vmem:[%s1168_s4 + $0x190] sm:$0xff] }
 0x19e   :  { %644 = vmatpush3.msra.mxu0 %v365_v46  ;;  %675 = vmatpush3.msra.mxu1 %v399_v51 }
 0x19f   :  { %224 = vadd.xlane.f32.xlu0 %v223_v17  ;;  %645 = vmatprep.subr.mxu0 %v380_v48  ;;  %v392_v17 = vld [vmem:[%s1168_s4 + $0x110] sm:$0xff] }
 0x1a0   :  { %646 = vmatpush3.msra.mxu0 %v364_v50  ;;  %676 = vmatprep.subr.mxu1 %v414_v53 }
 0x1a1   :  { %647 = vmatprep.subr.mxu0 %v379_v52  ;;  %677 = vmatpush3.msra.mxu1 %v398_v56 }
 0x1a2   :  { %648 = vmatpush3.msra.mxu0 %v363_v54  ;;  %678 = vmatprep.subr.mxu1 %v413_v59 }
 0x1a3   :  { %326 = vadd.xlane.f32.xlu0 %v954_v15  ;;  %649 = vmatprep.subr.mxu0 %v378_v58 }
 0x1a4   :  { %650 = vmatpush3.msra.mxu0 %v362_v60  ;;  %679 = vmatpush3.msra.mxu1 %v397_v61 }
 0x1a5   :  { %651 = vmatprep.subr.mxu0 %v377_v62  ;;  %680 = vmatprep.subr.mxu1 %v412_v0 }
 0x1a6   :  { %652 = vmatpush3.msra.mxu0 %v361_v1  ;;  %681 = vmatpush3.msra.mxu1 %v396_v2 }
 0x1a7   :  { %653 = vmatprep.subr.mxu0 %v376_v4  ;;  %682 = vmatprep.subr.mxu1 %v411_v5 }
 0x1a8   :  { %654 = vmatpush3.msra.mxu0 %v360_v6  ;;  %683 = vmatpush3.msra.mxu1 %v395_v57 }
 0x1a9   :  { %655 = vmatprep.subr.mxu0 %v375_v7  ;;  %684 = vmatprep.subr.mxu1 %v410_v8 }
 0x1aa   :  { %656 = vmatpush3.msra.mxu0 %v359_v9  ;;  %685 = vmatpush3.msra.mxu1 %v394_v10 }
 0x1ab   :  { %657 = vmatprep.subr.mxu0 %v374_v11  ;;  %686 = vmatprep.subr.mxu1 %v409_v55 }
 0x1ac   :  { %658 = vmatpush3.msra.mxu0 %v358_v12  ;;  %687 = vmatpush3.msra.mxu1 %v393_v14 }
 0x1ad   :  { %688 = vmatprep.subr.mxu1 %v408_v16 }
 0x1ae   :  { %689 = vmatpush3.msra.mxu1 %v392_v17 }
 0x1af   :  { %690 = vmatprep.subr.mxu1 %v407_v18 }
 0x1b0   :  { %691 = vmatpush3.msra.mxu1 %v391_v19 }
 0x1b1   :  { %692 = vmatprep.subr.mxu1 %v406_v20 }
 0x1b2   :  { %693 = vmatpush3.msra.mxu1 %v390_v21 }
 0x21c   :  { %v156_v22 = vpop.xlane.xlu0 %155 }
 0x21d   :  { %v157_v23 = vrot.slane %v156_v22, 4 }
 0x21e   :  { %v168_v24 = vpop.xlane.xlu1 %167 }
 0x21f   :  { %v158_v25 = vadd.f32 %v157_v23, %v156_v22  ;;  %v169_v26 = vrot.slane %v168_v24, 4 }
 0x220   :  { %v213_v27 = vpop.xlane.xlu0 %212 }
 0x221   :  { %v159_v28 = vrot.slane %v158_v25, 2  ;;  %v170_v29 = vadd.f32 %v169_v26, %v168_v24  ;;  %v214_v30 = vrot.slane %v213_v27, 4 }
 0x222   :  { %v282_v31 = vpop.xlane.xlu1 %281 }
 0x223   :  { %v171_v32 = vrot.slane %v170_v29, 2  ;;  %v215_v33 = vadd.f32 %v214_v30, %v213_v27  ;;  %v283_v34 = vrot.slane %v282_v31, 4  ;;  %v160_v35 = vadd.f32 %v159_v28, %v158_v25 }
 0x224   :  { %v270_v36 = vpop.xlane.xlu0 %269 }
 0x225   :  { %v216_v37 = vrot.slane %v215_v33, 2  ;;  %v284_v38 = vadd.f32 %v283_v34, %v282_v31  ;;  %v271_v39 = vrot.slane %v270_v36, 4  ;;  %v161_v40 = vrot.slane %v160_v35, 1 }
 0x226   :  { %v339_v41 = vpop.xlane.xlu1 %338  ;;  %v172_v42 = vadd.f32 %v171_v32, %v170_v29 }
 0x227   :  { %v272_v43 = vadd.f32 %v271_v39, %v270_v36  ;;  %v340_v44 = vrot.slane %v339_v41, 4  ;;  %v162_v45 = vadd.f32 %v161_v40, %v160_v35  ;;  %v217_v48 = vadd.f32 %v216_v37, %v215_v33 }
 0x228   :  { %v225_v46 = vpop.xlane.xlu0 %224  ;;  %v173_v47 = vrot.slane %v172_v42, 1  ;;  %v285_v49 = vrot.slane %v284_v38, 2 }
 0x229   :  { %v273_v50 = vrot.slane %v272_v43, 2  ;;  %v341_v51 = vadd.f32 %v340_v44, %v339_v41  ;;  %v226_v52 = vrot.slane %v225_v46, 4  ;;  %705 = vpush %v162_v45  ;;  %v218_v54 = vrot.slane %v217_v48, 1 }
 0x22a   :  { %v174_v53 = vadd.f32 %v173_v47, %v172_v42  ;;  %v286_v1 = vadd.f32 %v285_v49, %v284_v38 }
 0x22b   :  { %v227_v56 = vadd.f32 %v226_v52, %v225_v46  ;;  %v342_v58 = vrot.slane %v341_v51, 2  ;;  %v219_v60 = vadd.f32 %v218_v54, %v217_v48  ;;  %v274_v61 = vadd.f32 %v273_v50, %v272_v43 }
 0x22c   :  { %707 = vpush %v174_v53  ;;  %v327_v59 = vpop.xlane.xlu0 %326  ;;  %v287_v8 = vrot.slane %v286_v1, 1 }
 0x22d   :  { %v228_v62 = vrot.slane %v227_v56, 2  ;;  %v328_v0 = vrot.slane %v327_v59, 4  ;;  %709 = vpush %v219_v60  ;;  %v343_v5 = vadd.f32 %v342_v58, %v341_v51  ;;  %v275_v6 = vrot.slane %v274_v61, 1 }
 0x22e   :  { %v288_v12 = vadd.f32 %v287_v8, %v286_v1 }
 0x22f   :  { %v329_v2 = vadd.f32 %v328_v0, %v327_v59  ;;  %v229_v4 = vadd.f32 %v228_v62, %v227_v56  ;;  %v276_v11 = vadd.f32 %v275_v6, %v274_v61  ;;  %v344_v55 = vrot.slane %v343_v5, 1 }
 0x231   :  { %v330_v57 = vrot.slane %v329_v2, 2  ;;  %v230_v7 = vrot.slane %v229_v4, 1  ;;  %v345_v17 = vadd.f32 %v344_v55, %v343_v5 }
 0x233   :  { %v331_v9 = vadd.f32 %v330_v57, %v329_v2  ;;  %v231_v10 = vadd.f32 %v230_v7, %v229_v4 }
 0x235   :  { %711 = vpush %v231_v10  ;;  %v332_v14 = vrot.slane %v331_v9, 1 }
 0x236   :  { %713 = vpush %v276_v11 }
 0x237   :  { %715 = vpush %v288_v12  ;;  %v333_v16 = vadd.f32 %v332_v14, %v331_v9 }
 0x239   :  { %717 = vpush %v333_v16 }
 0x23a   :  { %719 = vpush %v345_v17 }
 0x25a   :  { %s706_s4 = spop %705 }
 0x25b   :  { %v164_v18 = vstv %s706_s4 }
 0x25c   :  { %v165_v19 = vmul.f32 0.0009765625, %v164_v18 }
 0x25d   :  { %s708_s29 = spop %707 }
 0x25e   :  { %v178_v20 = vmul.f32 %v165_v19, %v165_v19  ;;  %v176_v21 = vstv %s708_s29  ;;  %s710_s2 = spop %709  ;;  %v181_v51 = vsub.f32 %v942_v3, %v165_v19 }
 0x25f   :  { %v177_v22 = vmul.f32 0.0009765625, %v176_v21  ;;  %v221_v24 = vstv %s710_s2 }
 0x260   :  { %v222_v25 = vmul.f32 0.0009765625, %v221_v24 }
 0x261   :  { %v179_v23 = vsub.f32 %v177_v22, %v178_v20 }
 0x262   :  { %v235_v28 = vmul.f32 %v222_v25, %v222_v25  ;;  %v238_v52 = vsub.f32 %v949_v13, %v222_v25 }
 0x263   :  { %v180_v26 = vmax.f32 %v179_v23, 0.0 }
 0x265   :  { %v182_v31 = vadd.f32 1e-05, %v180_v26 }
 0x266   :  { %s712_s3 = spop %711 }
 0x267   :  { %v233_v27 = vstv %s712_s3  ;;  %s714_s30 = spop %713  ;;  %733 = vrsqrt.f32 %v182_v31 }
 0x268   :  { %v234_v29 = vmul.f32 0.0009765625, %v233_v27  ;;  %v278_v30 = vstv %s714_s30  ;;  %s716_s7 = spop %715 }
 0x269   :  { %v279_v32 = vmul.f32 0.0009765625, %v278_v30  ;;  %v290_v33 = vstv %s716_s7 }
 0x26a   :  { %v236_v34 = vsub.f32 %v234_v29, %v235_v28  ;;  %s718_s8 = spop %717  ;;  %v291_v36 = vmul.f32 0.0009765625, %v290_v33 }
 0x26b   :  { %v292_v35 = vmul.f32 %v279_v32, %v279_v32  ;;  %v335_v37 = vstv %s718_s8  ;;  %s720_s0 = spop %719  ;;  %v295_v60 = vsub.f32 %v947_v63, %v279_v32  ;;  %v626_v63 = vld [vmem:[%s1169_s5] ss:$0 sm:$0xff] }
 0x26c   :  { %v237_v38 = vmax.f32 %v236_v34, 0.0  ;;  %v336_v39 = vmul.f32 0.0009765625, %v335_v37  ;;  %v347_v40 = vstv %s720_s0 }
 0x26d   :  { %v293_v41 = vsub.f32 %v291_v36, %v292_v35  ;;  %v348_v44 = vmul.f32 0.0009765625, %v347_v40 }
 0x26e   :  { %v239_v42 = vadd.f32 1e-05, %v237_v38  ;;  %v349_v43 = vmul.f32 %v336_v39, %v336_v39  ;;  %v352_v62 = vsub.f32 %v954_v15, %v336_v39 }
 0x26f   :  { %v294_v45 = vmax.f32 %v293_v41, 0.0 }
 0x270   :  { %735 = vrsqrt.f32 %v239_v42  ;;  %v350_v46 = vsub.f32 %v348_v44, %v349_v43 }
 0x271   :  { %v296_v47 = vadd.f32 1e-05, %v294_v45 }
 0x272   :  { %v351_v48 = vmax.f32 %v350_v46, 0.0 }
 0x273   :  { %737 = vrsqrt.f32 %v296_v47 }
 0x274   :  { %v353_v49 = vadd.f32 1e-05, %v351_v48  ;;  %v734_v50 = vpop.eup %733 }
 0x275   :  { %v184_v54 = vmul.f32 %v734_v50, %v181_v51 }
 0x276   :  { %739 = vrsqrt.f32 %v353_v49 }
 0x277   :  { %v185_v61 = vmax.f32 %v184_v54, 0.0 }
 0x27d   :  { %v736_v53 = vpop.eup %735 }
 0x27e   :  { %v241_v56 = vmul.f32 %v736_v53, %v238_v52 }
 0x280   :  { %v738_v58 = vpop.eup %737  ;;  %v242_v59 = vmax.f32 %v241_v56, 0.0 }
 0x281   :  { %v298_v1 = vmul.f32 %v738_v58, %v295_v60 }
 0x282   :  { %486 = vmatprep.mubr.f32.mxu0 %v242_v59 }
 0x283   :  { %v740_v0 = vpop.eup %739  ;;  %487 = vmatmul.mubr.f32.vlgmr.msra.gmra.mxu0 %v185_v61  ;;  %v299_v5 = vmax.f32 %v298_v1, 0.0 }
 0x284   :  { %v355_v2 = vmul.f32 %v740_v0, %v352_v62 }
 0x286   :  { %v356_v4 = vmax.f32 %v355_v2, 0.0 }
 0x288   :  { %556 = vmatprep.mubr.f32.mxu1 %v356_v4 }
 0x289   :  { %557 = vmatmul.mubr.f32.vlgmr.msra.gmra.mxu1 %v299_v5 }
 0x343   :  { %v659_v3 = vpop.f32.mrf.mxu0 }
 0x345   :  { %v660_v13 = vpop.f32.mrf.mxu0 }
 0x346   :  { %v661_v7 = vadd.f32 %v660_v13, %v659_v3 }
 0x349   :  { %v694_v6 = vpop.f32.mrf.mxu1 }
 0x34b   :  { %v695_v57 = vpop.f32.mrf.mxu1 }
 0x34c   :  { %v696_v8 = vadd.f32 %v695_v57, %v694_v6 }
 0x34e   :  { %v559_v9 = vadd.f32 %v696_v8, %v661_v7 }
 0x350   :  { %v568_v15 = vadd.f32 %v626_v63, %v559_v9 }
 0x352   :  { %v569_v10 = vrot.slane %v568_v15, 4  ;;  %v577_v11 = vmul.f32 %v568_v15, %v568_v15 }
 0x354   :  { %v570_v55 = vadd.f32 %v569_v10, %v568_v15  ;;  %v578_v12 = vrot.slane %v577_v11, 4 }
 0x356   :  { %v571_v14 = vrot.slane %v570_v55, 2  ;;  %v579_v16 = vadd.f32 %v578_v12, %v577_v11 }
 0x358   :  { %v572_v17 = vadd.f32 %v571_v14, %v570_v55  ;;  %v580_v18 = vrot.slane %v579_v16, 2 }
 0x35a   :  { %v573_v19 = vrot.slane %v572_v17, 1  ;;  %v581_v20 = vadd.f32 %v580_v18, %v579_v16 }
 0x35c   :  { %v574_v21 = vadd.f32 %v573_v19, %v572_v17  ;;  %v582_v22 = vrot.slane %v581_v20, 1 }
 0x35e   :  { %v576_v23 = vmul.f32 0.125, %v574_v21  ;;  %v583_v24 = vadd.f32 %v582_v22, %v581_v20 }
 0x360   :  { %v584_v25 = vmul.f32 0.125, %v583_v24  ;;  %v585_v26 = vmul.f32 %v576_v23, %v576_v23  ;;  %v588_v30 = vsub.f32 %v568_v15, %v576_v23 }
 0x362   :  { %v586_v27 = vsub.f32 %v584_v25, %v585_v26 }
 0x364   :  { %v587_v28 = vmax.f32 %v586_v27, 0.0 }
 0x366   :  { %v589_v29 = vadd.f32 1e-05, %v587_v28 }
 0x368   :  { %741 = vrsqrt.f32 %v589_v29 }
 0x375   :  { %v742_v31 = vpop.eup %741 }
 0x376   :  { %v591_v32 = vmul.f32 %v742_v31, %v588_v30 }
 0x378   :  { %v592_v33 = vmax.f32 %v591_v32, 0.0 }
 0x37a   :  { %593 = vst [vmem:[%s1170_s6] sm:$0xff] %v592_v33 }
 0x37b   :  { %598 = vsyncpa [#allocation3], 1 }
 0x37c   :  { %599 = vsyncpa [#allocation5], 1 }

// kernel: _timestep.3
= control target key start
LH: loop header
LB: loop body
LE: loop exit
PB: predicated region body
PF: predicated region fallthrough
CT: control target
= control target key end

     0   :  { %7 = vsyncpa [#allocation3], 0  ;;  %s1663_s0 = inlined_call_operand.vmem [shape: f32[8,128], index: 0, kind: input, shape index: {}]   ;;  %s1664_s1 = inlined_call_operand.hbm [shape: f32[2048,128], index: 1, kind: input, shape index: {}]   ;;  %s1665_s2 = inlined_call_operand.hbm [shape: f32[8,2048], index: 2, kind: output, shape index: {}]  }
   0x1   :  { %9 = vsyncpa [#allocation3 + $0x1], 0 }
   0x2   :  { %10 = vsyncpa [#allocation4], 0 }
   0x3   :  { %12 = vsyncpa [#allocation4 + $0x1], 0  ;;  %s1367_s9 = smov 0   ;;  %s1369_s10 = smov 0  }
   0x4   :  { %s1371_s11 = smov 0   ;;  %s1373_s12 = smov 0  }
   0x5 LB: > { %s1388_s13 = sadd.s32 4294967295, %s1346_s12   ;;  %s798_s14 = sadd.s32 4294967294, %s1346_s12   ;;  %s1346_s12 = sphi %s1373_s12, %s1680_s12   ;;  %s1342_s11 = sphi %s1371_s11, %s1679_s11   ;;  %s1338_s10 = sphi %s1369_s10, %s1678_s10   ;;  %s1334_s9 = sphi %s1367_s9, %s1677_s9  }
   0x6   : > { %s1392_s15 = sadd.s32 1, %s1346_s12   ;;  %s46_s16 = sadd.s32 1, %s1342_s11 }
   0x7   : > { %s43_s17 = ssub.s32 %s1346_s12, %s1392_s15  ;;  %p53_p0 = scmp.ne.s32.totalorder %s1342_s11, %s1338_s10 }
   0x8   : > { %p44_p1 = scmp.eq.s32.totalorder %s43_s17, 0  ;;  %p54_p2 = scmp.eq.s32.totalorder %s1346_s12, 0 }
   0x9   : > { %p59_p3 = scmp.ne.s32.totalorder %s1338_s10, %s1334_s9  ;;  %p60_p4 = scmp.eq.s32.totalorder %s1388_s13, 0 }
   0xa   : > { %s1404_s18 = scalar_select %p44_p1, %s1342_s11, %s46_s16  }
   0xb   : > { %p1406_p5 = por %p54_p2, %p53_p0  ;;  %p1410_p6 = por %p60_p4, %p59_p3 }
   0xc   : > { %p83_p7 = scmp.eq.s32.totalorder %s1388_s13, 1  ;;  %p89_p8 = scmp.eq.s32.totalorder %s798_s14, 1 }
   0xd   : > { %s1669_s20 = scalar_select %p1410_p6, 1, 0 }
   0xe   : > { %p962_p10 = scmp.lt.s32.totalorder %s1346_s12, 2  ;;  %p1417_p11 = por %p83_p7, %p53_p0 }
   0xf   : > { %p1421_p12 = por %p89_p8, %p59_p3  ;;  %s112_s23 = sand.u32 1, %s1342_s11  }
  0x10   : > { %s1670_s21 = scalar_select %p1417_p11, 1, 0 }
  0x11   : > { %s1671_s22 = scalar_select %p1421_p12, 1, 0 }
  0x12   : > { %s812_s24 = sshll.u32 %s1346_s12, 14  ;;  %s801_s25 = sshll.u32 %s112_s23, 10 }
  0x13   : > { %s1430_s28 = scalar_lea.hbm %s1664_s1, %s812_s24  ;;  %s116_s29 = scalar_lea.vmem [#allocation2], %s801_s25 }
  0x14   : > { %s123_s30 = sshll.u32 %s116_s29, 4  ;;  %p1434_p13 = pnand %p962_p10, %p1406_p5  ;;  %s1438_s30 = int_to_ptr.vmem [resolvable:$true] %s123_s30 }
  0x15   : > { %s1440_s4 = scalar_lea.sflag [#allocation3], %s112_s23  ;;  %s1254_s5 = scalar_lea.hbm %s1430_s28, 16384 }
  0x16   : > { %p1255_p0 = scmp.ne.s32.totalorder %s1430_s28, %s1254_s5  ;;  %p1256_p1 = pneg %p1434_p13 }
  0x17   : > { %s1259_s8 = scalar_lea.hbm %s1664_s1, 32768  ;;  %p1260_p4 = scmp.lt.s32.totalorder %s1430_s28, %s1664_s1 }
  0x18   : > { %p1257_p2 = pnand %p1256_p1, %p1255_p0  ;;  %p1261_p5 = scmp.lt.s32.totalorder %s1259_s8, %s1254_s5 }
  0x1a   : > { %p1258_p3 = pneg %p1257_p2  ;;  %p1262_p7 = por %p1261_p5, %p1260_p4 }
  0x1c   : > { %p1263_p8 = pnand %p1262_p7, %p1258_p3 }
  0x1e   : > { %1266 = shalt.err (!%p1263_p8)
}
  0x1f   : > { %s1267_s17 = scalar_lea.vmem %s1438_s30, 16384  ;;  %s1348_s19 = smov [#allocation2]  }
  0x20   : > { %p1268_p10 = scmp.ne.s32.totalorder %s1438_s30, %s1267_s17  ;;  %s1272_s23 = sshll.u32 %s1348_s19, 4  ;;  %s1273_s23 = int_to_ptr.vmem [resolvable:$false] %s1272_s23 }
  0x21   : > { %s1274_s24 = scalar_lea.vmem %s1273_s23, 32768  ;;  %p1275_p2 = scmp.lt.s32.totalorder %s1438_s30, %s1273_s23 }
  0x22   : > { %p1270_p9 = pnand %p1268_p10, %p1256_p1  ;;  %p1276_p12 = scmp.lt.s32.totalorder %s1274_s24, %s1267_s17 }
  0x24   : > { %p1271_p0 = pneg %p1270_p9  ;;  %p1277_p11 = por %p1276_p12, %p1275_p2 }
  0x26   : > { %p1278_p6 = pnand %p1277_p11, %p1271_p0 }
  0x28   : > { %1281 = shalt.err (!%p1278_p6)
}
  0x29   : > { %s1349_s25 = smov 128   ;;  %s1350_s26 = smov 8  }
  0x2a   : > { %957 = dma.hbm_to_vmem [thread:$0]  (!%p1434_p13), %s1430_s28, 16384, %s1438_s30, %s1440_s4, %s1349_s25, %s1349_s25, %s1350_s26  }
  0x2b   : > { %p804_p9 = scmp.ge.s32.totalorder %s1346_s12, 1  ;;  %p131_p1 = scmp.lt.s32.totalorder %s1346_s12, 3 }
  0x2d   : > { %p132_p3 = pnand %p804_p9, %p131_p1 }
  0x2e   : > { %s1464_s27 = sand.u32 (!%p132_p3), 1, %s1338_s10   ;;  %p1673_p6 = scmp.ne.s32.totalorder (!%p132_p3), %s1669_s20, 0 }
  0x2f   : > { %135 = sbr.rel (%p132_p3) target bundleno = 406 (0x196), region = 28  ;;  %s805_s29 = sshll.u32 (!%p132_p3), %s1464_s27, 10 }
  0x30   : > { %s138_s5 = scalar_lea.sflag (!%p132_p3), [#allocation3], %s1464_s27  ;;  %s1468_s6 = scalar_lea.vmem (!%p132_p3), [#allocation2], %s805_s29 }
  0x34   : > { %1325 = dma.done.wait (%p1673_p6), %s138_s5, 16384  }
  0x35   : > { %1327 = vsyncadd (%p1673_p6), %s138_s5, 4294950912  ;;  %v195_v0 = vld [vmem:[%s1468_s6 + $0xf8] sm:$0xff]  ;;  %v194_v4 = vld [vmem:[%s1468_s6 + $0xf0] sm:$0xff]  ;;  %s806_s30 = sshll.u32 %s1464_s27, 6  ;;  %s813_s4 = sshll.u32 %s1388_s13, 10 }
  0x36   : > { %v227_v1 = vld [vmem:[%s1468_s6 + $0x1f8] sm:$0xff]  ;;  %998 = vtanh.f32 %v195_v0  ;;  %v226_v5 = vld [vmem:[%s1468_s6 + $0x1f0] sm:$0xff]  ;;  %v193_v8 = vld [vmem:[%s1468_s6 + $0xe8] sm:$0xff]  ;;  %s161_s3 = scalar_lea.vmem [#allocation5], %s806_s30  ;;  %s1620_s16 = scalar_lea.hbm %s1665_s2, %s813_s4 }
  0x37   : > { %v179_v2 = vld [vmem:[%s1468_s6 + $0x78] sm:$0xff]  ;;  %1000 = vtanh.f32 %v227_v1  ;;  %v178_v6 = vld [vmem:[%s1468_s6 + $0x70] sm:$0xff]  ;;  %v225_v9 = vld [vmem:[%s1468_s6 + $0x1e8] sm:$0xff]  ;;  %s728_s7 = sshll.u32 %s161_s3, 4  ;;  %s714_s13 = scalar_lea.sflag [#allocation4], %s1464_s27  ;;  %s1622_s7 = int_to_ptr.vmem [resolvable:$true] %s728_s7 }
  0x38   : > { %v211_v3 = vld [vmem:[%s1468_s6 + $0x178] sm:$0xff]  ;;  %1002 = vtanh.f32 %v179_v2  ;;  %v210_v7 = vld [vmem:[%s1468_s6 + $0x170] sm:$0xff]  ;;  %v177_v10 = vld [vmem:[%s1468_s6 + $0x68] sm:$0xff]  ;;  %s1282_s17 = scalar_lea.vmem %s1622_s7, 1024  ;;  %p1674_p12 = scmp.ne.s32.totalorder %s1670_s21, 0 }
  0x39   : > { %1004 = vtanh.f32 %v211_v3  ;;  %v209_v11 = vld [vmem:[%s1468_s6 + $0x168] sm:$0xff]  ;;  %v192_v12 = vld [vmem:[%s1468_s6 + $0xe0] sm:$0xff]  ;;  %v191_v17 = vld [vmem:[%s1468_s6 + $0xd8] sm:$0xff]  ;;  %p1283_p11 = scmp.ne.s32.totalorder %s1622_s7, %s1282_s17  ;;  %s1351_s19 = smov [#allocation5]  }
  0x3a   : > { %1006 = vtanh.f32 %v194_v4  ;;  %v224_v13 = vld [vmem:[%s1468_s6 + $0x1e0] sm:$0xff]  ;;  %v223_v19 = vld [vmem:[%s1468_s6 + $0x1d8] sm:$0xff]  ;;  %v190_v25 = vld [vmem:[%s1468_s6 + $0xd0] sm:$0xff]  ;;  %s1286_s23 = sshll.u32 %s1351_s19, 4  ;;  %s1287_s23 = int_to_ptr.vmem [resolvable:$false] %s1286_s23 }
  0x3b   : > { %1008 = vtanh.f32 %v226_v5  ;;  %v176_v14 = vld [vmem:[%s1468_s6 + $0x60] sm:$0xff]  ;;  %v175_v21 = vld [vmem:[%s1468_s6 + $0x58] sm:$0xff]  ;;  %v222_v27 = vld [vmem:[%s1468_s6 + $0x1d0] sm:$0xff]  ;;  %p1284_p13 = pnand %p1283_p11, %p1674_p12  ;;  %s1288_s24 = scalar_lea.vmem %s1287_s23, 2048 }
  0x3c   : > { %1010 = vtanh.f32 %v178_v6  ;;  %v208_v15 = vld [vmem:[%s1468_s6 + $0x160] sm:$0xff]  ;;  %v207_v23 = vld [vmem:[%s1468_s6 + $0x158] sm:$0xff]  ;;  %v174_v29 = vld [vmem:[%s1468_s6 + $0x50] sm:$0xff]  ;;  %p1289_p5 = scmp.lt.s32.totalorder %s1622_s7, %s1287_s23  ;;  %p1290_p7 = scmp.lt.s32.totalorder %s1288_s24, %s1282_s17 }
  0x3d   : > { %1012 = vtanh.f32 %v210_v7  ;;  %v206_v31 = vld [vmem:[%s1468_s6 + $0x150] sm:$0xff]  ;;  %v1501_v32 = vld [vmem:[%s1663_s0] sm:$0xff]  ;;  %v189_v34 = vld [vmem:[%s1468_s6 + $0xc8] sm:$0xff]  ;;  %p1285_p4 = pneg %p1284_p13 }
  0x3e   : > { %1014 = vtanh.f32 %v193_v8  ;;  %846 = vmatprep.mubr.f32.mxu0 %v1501_v32  ;;  %v221_v36 = vld [vmem:[%s1468_s6 + $0x1c8] sm:$0xff]  ;;  %880 = vmatprep.mubr.f32.mxu1 %v1501_v32  ;;  %v188_v42 = vld [vmem:[%s1468_s6 + $0xc0] sm:$0xff]  ;;  %v187_v50 = vld [vmem:[%s1468_s6 + $0xb8] sm:$0xff]  ;;  %p1291_p8 = por %p1290_p7, %p1289_p5 }
  0x3f   : > { %1016 = vtanh.f32 %v225_v9  ;;  %v173_v38 = vld [vmem:[%s1468_s6 + $0x48] sm:$0xff]  ;;  %v220_v44 = vld [vmem:[%s1468_s6 + $0x1c0] sm:$0xff]  ;;  %v219_v52 = vld [vmem:[%s1468_s6 + $0x1b8] sm:$0xff] }
  0x40   : > { %1018 = vtanh.f32 %v177_v10  ;;  %v205_v40 = vld [vmem:[%s1468_s6 + $0x148] sm:$0xff]  ;;  %v172_v46 = vld [vmem:[%s1468_s6 + $0x40] sm:$0xff]  ;;  %v171_v54 = vld [vmem:[%s1468_s6 + $0x38] sm:$0xff]  ;;  %p1292_p10 = pnand %p1291_p8, %p1285_p4 }
  0x41   : > { %1020 = vtanh.f32 %v209_v11  ;;  %v204_v48 = vld [vmem:[%s1468_s6 + $0x140] sm:$0xff]  ;;  %v203_v56 = vld [vmem:[%s1468_s6 + $0x138] sm:$0xff]  ;;  %v186_v58 = vld [vmem:[%s1468_s6 + $0xb0] sm:$0xff] }
  0x42   : > { %1022 = vtanh.f32 %v192_v12  ;;  %v218_v60 = vld [vmem:[%s1468_s6 + $0x1b0] sm:$0xff]  ;;  %v185_v2 = vld [vmem:[%s1468_s6 + $0xa8] sm:$0xff]  ;;  %v184_v10 = vld [vmem:[%s1468_s6 + $0xa0] sm:$0xff] }
  0x43   : > { %v999_v16 = vpop.eup %998  ;;  %1024 = vtanh.f32 %v224_v13  ;;  %v170_v62 = vld [vmem:[%s1468_s6 + $0x30] sm:$0xff]  ;;  %v217_v4 = vld [vmem:[%s1468_s6 + $0x1a8] sm:$0xff]  ;;  %v216_v12 = vld [vmem:[%s1468_s6 + $0x1a0] sm:$0xff] }
  0x44   : > { %v1001_v18 = vpop.eup %1000  ;;  %814 = vmatprep.subr.mxu0 %v999_v16  ;;  %1026 = vtanh.f32 %v176_v14  ;;  %v202_v0 = vld [vmem:[%s1468_s6 + $0x130] sm:$0xff]  ;;  %v169_v6 = vld [vmem:[%s1468_s6 + $0x28] sm:$0xff]  ;;  %v168_v14 = vld [vmem:[%s1468_s6 + $0x20] sm:$0xff] }
  0x45   : > { %v1003_v20 = vpop.eup %1002  ;;  %848 = vmatprep.subr.mxu1 %v1001_v18  ;;  %1028 = vtanh.f32 %v208_v15  ;;  %v201_v8 = vld [vmem:[%s1468_s6 + $0x128] sm:$0xff]  ;;  %v200_v16 = vld [vmem:[%s1468_s6 + $0x120] sm:$0xff]  ;;  %v183_v18 = vld [vmem:[%s1468_s6 + $0x98] sm:$0xff] }
  0x46   : > { %v1005_v22 = vpop.eup %1004  ;;  %815 = vmatpush3.xpose.msra.mxu0 %v1003_v20  ;;  %1030 = vtanh.f32 %v191_v17  ;;  %v215_v20 = vld [vmem:[%s1468_s6 + $0x198] sm:$0xff] }
  0x47   : > { %v1007_v24 = vpop.eup %1006  ;;  %849 = vmatpush3.xpose.msra.mxu1 %v1005_v22  ;;  %1032 = vtanh.f32 %v223_v19  ;;  %v167_v22 = vld [vmem:[%s1468_s6 + $0x18] sm:$0xff] }
  0x48   : > { %v1009_v26 = vpop.eup %1008  ;;  %816 = vmatprep.subr.mxu0 %v1007_v24  ;;  %1034 = vtanh.f32 %v175_v21  ;;  %v199_v24 = vld [vmem:[%s1468_s6 + $0x118] sm:$0xff] }
  0x49   : > { %v1011_v28 = vpop.eup %1010  ;;  %850 = vmatprep.subr.mxu1 %v1009_v26  ;;  %1036 = vtanh.f32 %v207_v23  ;;  %v182_v26 = vld [vmem:[%s1468_s6 + $0x90] sm:$0xff] }
  0x4a   : > { %v1013_v30 = vpop.eup %1012  ;;  %817 = vmatpush3.xpose.msra.mxu0 %v1011_v28  ;;  %1038 = vtanh.f32 %v190_v25  ;;  %v214_v28 = vld [vmem:[%s1468_s6 + $0x190] sm:$0xff] }
  0x4b   : > { %v1015_v33 = vpop.eup %1014  ;;  %851 = vmatpush3.xpose.msra.mxu1 %v1013_v30  ;;  %1040 = vtanh.f32 %v222_v27  ;;  %v166_v30 = vld [vmem:[%s1468_s6 + $0x10] sm:$0xff] }
  0x4c   : > { %v1017_v35 = vpop.eup %1016  ;;  %818 = vmatprep.subr.mxu0 %v1015_v33  ;;  %1042 = vtanh.f32 %v174_v29  ;;  %v198_v33 = vld [vmem:[%s1468_s6 + $0x110] sm:$0xff] }
  0x4d   : > { %v1019_v37 = vpop.eup %1018  ;;  %852 = vmatprep.subr.mxu1 %v1017_v35  ;;  %1044 = vtanh.f32 %v206_v31  ;;  %v181_v35 = vld [vmem:[%s1468_s6 + $0x88] sm:$0xff] }
  0x4e   : > { %v1021_v39 = vpop.eup %1020  ;;  %819 = vmatpush3.xpose.msra.mxu0 %v1019_v37  ;;  %1046 = vtanh.f32 %v189_v34  ;;  %v213_v37 = vld [vmem:[%s1468_s6 + $0x188] sm:$0xff] }
  0x4f   : > { %v1023_v41 = vpop.eup %1022  ;;  %853 = vmatpush3.xpose.msra.mxu1 %v1021_v39  ;;  %1048 = vtanh.f32 %v221_v36  ;;  %v165_v39 = vld [vmem:[%s1468_s6 + $0x8] sm:$0xff] }
  0x50   : > { %v1025_v43 = vpop.eup %1024  ;;  %820 = vmatprep.subr.mxu0 %v1023_v41  ;;  %1050 = vtanh.f32 %v173_v38  ;;  %v197_v41 = vld [vmem:[%s1468_s6 + $0x108] sm:$0xff] }
  0x51   : > { %v1027_v45 = vpop.eup %1026  ;;  %854 = vmatprep.subr.mxu1 %v1025_v43  ;;  %1052 = vtanh.f32 %v205_v40  ;;  %v180_v43 = vld [vmem:[%s1468_s6 + $0x80] sm:$0xff] }
  0x52   : > { %v1029_v47 = vpop.eup %1028  ;;  %821 = vmatpush3.xpose.msra.mxu0 %v1027_v45  ;;  %1054 = vtanh.f32 %v188_v42  ;;  %v212_v45 = vld [vmem:[%s1468_s6 + $0x180] sm:$0xff] }
  0x53   : > { %v1031_v49 = vpop.eup %1030  ;;  %855 = vmatpush3.xpose.msra.mxu1 %v1029_v47  ;;  %1056 = vtanh.f32 %v220_v44  ;;  %v164_v47 = vld [vmem:[%s1468_s6] sm:$0xff] }
  0x54   : > { %v1033_v51 = vpop.eup %1032  ;;  %822 = vmatprep.subr.mxu0 %v1031_v49  ;;  %1058 = vtanh.f32 %v172_v46  ;;  %v196_v49 = vld [vmem:[%s1468_s6 + $0x100] sm:$0xff] }
  0x55   : > { %v1035_v53 = vpop.eup %1034  ;;  %856 = vmatprep.subr.mxu1 %v1033_v51  ;;  %1060 = vtanh.f32 %v204_v48  ;;  %v259_v51 = vld [vmem:[%s1468_s6 + $0x2f8] sm:$0xff] }
  0x56   : > { %v1037_v55 = vpop.eup %1036  ;;  %823 = vmatpush3.xpose.msra.mxu0 %v1035_v53  ;;  %1062 = vtanh.f32 %v187_v50  ;;  %v291_v53 = vld [vmem:[%s1468_s6 + $0x3f8] sm:$0xff] }
  0x57   : > { %v1039_v57 = vpop.eup %1038  ;;  %857 = vmatpush3.xpose.msra.mxu1 %v1037_v55  ;;  %1064 = vtanh.f32 %v219_v52  ;;  %v243_v55 = vld [vmem:[%s1468_s6 + $0x278] sm:$0xff] }
  0x58   : > { %v1041_v59 = vpop.eup %1040  ;;  %824 = vmatprep.subr.mxu0 %v1039_v57  ;;  %1066 = vtanh.f32 %v171_v54  ;;  %v275_v57 = vld [vmem:[%s1468_s6 + $0x378] sm:$0xff] }
  0x59   : > { %v1043_v61 = vpop.eup %1042  ;;  %858 = vmatprep.subr.mxu1 %v1041_v59  ;;  %1068 = vtanh.f32 %v203_v56  ;;  %v258_v59 = vld [vmem:[%s1468_s6 + $0x2f0] sm:$0xff] }
  0x5a   : > { %v1045_v63 = vpop.eup %1044  ;;  %825 = vmatpush3.xpose.msra.mxu0 %v1043_v61  ;;  %1070 = vtanh.f32 %v186_v58  ;;  %v290_v61 = vld [vmem:[%s1468_s6 + $0x3f0] sm:$0xff] }
  0x5b   : > { %v1047_v1 = vpop.eup %1046  ;;  %859 = vmatpush3.xpose.msra.mxu1 %v1045_v63  ;;  %1072 = vtanh.f32 %v218_v60  ;;  %v242_v63 = vld [vmem:[%s1468_s6 + $0x270] sm:$0xff] }
  0x5c   : > { %v1049_v3 = vpop.eup %1048  ;;  %826 = vmatprep.subr.mxu0 %v1047_v1  ;;  %1074 = vtanh.f32 %v170_v62  ;;  %v274_v1 = vld [vmem:[%s1468_s6 + $0x370] sm:$0xff] }
  0x5d   : > { %v1051_v5 = vpop.eup %1050  ;;  %860 = vmatprep.subr.mxu1 %v1049_v3  ;;  %1076 = vtanh.f32 %v202_v0  ;;  %v257_v3 = vld [vmem:[%s1468_s6 + $0x2e8] sm:$0xff] }
  0x5e   : > { %v1053_v7 = vpop.eup %1052  ;;  %827 = vmatpush3.xpose.msra.mxu0 %v1051_v5  ;;  %1078 = vtanh.f32 %v185_v2  ;;  %v289_v5 = vld [vmem:[%s1468_s6 + $0x3e8] sm:$0xff] }
  0x5f   : > { %v1055_v9 = vpop.eup %1054  ;;  %861 = vmatpush3.xpose.msra.mxu1 %v1053_v7  ;;  %1080 = vtanh.f32 %v217_v4  ;;  %v241_v7 = vld [vmem:[%s1468_s6 + $0x268] sm:$0xff] }
  0x60   : > { %v1057_v11 = vpop.eup %1056  ;;  %828 = vmatprep.subr.mxu0 %v1055_v9  ;;  %1082 = vtanh.f32 %v169_v6  ;;  %v273_v9 = vld [vmem:[%s1468_s6 + $0x368] sm:$0xff] }
  0x61   : > { %v1059_v13 = vpop.eup %1058  ;;  %862 = vmatprep.subr.mxu1 %v1057_v11  ;;  %1084 = vtanh.f32 %v201_v8  ;;  %v256_v11 = vld [vmem:[%s1468_s6 + $0x2e0] sm:$0xff] }
  0x62   : > { %v1061_v15 = vpop.eup %1060  ;;  %829 = vmatpush3.xpose.msra.mxu0 %v1059_v13  ;;  %1086 = vtanh.f32 %v184_v10  ;;  %v288_v13 = vld [vmem:[%s1468_s6 + $0x3e0] sm:$0xff] }
  0x63   : > { %v1063_v17 = vpop.eup %1062  ;;  %863 = vmatpush3.xpose.msra.mxu1 %v1061_v15  ;;  %1088 = vtanh.f32 %v216_v12  ;;  %v240_v15 = vld [vmem:[%s1468_s6 + $0x260] sm:$0xff] }
  0x64   : > { %v1065_v19 = vpop.eup %1064  ;;  %830 = vmatprep.subr.mxu0 %v1063_v17  ;;  %1090 = vtanh.f32 %v168_v14  ;;  %v272_v17 = vld [vmem:[%s1468_s6 + $0x360] sm:$0xff] }
  0x65   : > { %v1067_v21 = vpop.eup %1066  ;;  %864 = vmatprep.subr.mxu1 %v1065_v19  ;;  %1092 = vtanh.f32 %v200_v16  ;;  %v255_v19 = vld [vmem:[%s1468_s6 + $0x2d8] sm:$0xff] }
  0x66   : > { %v1069_v23 = vpop.eup %1068  ;;  %831 = vmatpush3.xpose.msra.mxu0 %v1067_v21  ;;  %1094 = vtanh.f32 %v183_v18  ;;  %v287_v21 = vld [vmem:[%s1468_s6 + $0x3d8] sm:$0xff] }
  0x67   : > { %v1071_v25 = vpop.eup %1070  ;;  %865 = vmatpush3.xpose.msra.mxu1 %v1069_v23  ;;  %1096 = vtanh.f32 %v215_v20  ;;  %v239_v23 = vld [vmem:[%s1468_s6 + $0x258] sm:$0xff] }
  0x68   : > { %v1073_v27 = vpop.eup %1072  ;;  %832 = vmatprep.subr.mxu0 %v1071_v25  ;;  %1098 = vtanh.f32 %v167_v22  ;;  %v271_v25 = vld [vmem:[%s1468_s6 + $0x358] sm:$0xff] }
  0x69   : > { %v1075_v29 = vpop.eup %1074  ;;  %866 = vmatprep.subr.mxu1 %v1073_v27  ;;  %1100 = vtanh.f32 %v199_v24  ;;  %v254_v27 = vld [vmem:[%s1468_s6 + $0x2d0] sm:$0xff] }
  0x6a   : > { %v1077_v31 = vpop.eup %1076  ;;  %833 = vmatpush3.xpose.msra.mxu0 %v1075_v29  ;;  %1102 = vtanh.f32 %v182_v26  ;;  %v286_v29 = vld [vmem:[%s1468_s6 + $0x3d0] sm:$0xff] }
  0x6b   : > { %v1079_v34 = vpop.eup %1078  ;;  %867 = vmatpush3.xpose.msra.mxu1 %v1077_v31  ;;  %1104 = vtanh.f32 %v214_v28  ;;  %v238_v31 = vld [vmem:[%s1468_s6 + $0x250] sm:$0xff] }
  0x6c   : > { %v1081_v36 = vpop.eup %1080  ;;  %834 = vmatprep.subr.mxu0 %v1079_v34  ;;  %1106 = vtanh.f32 %v166_v30  ;;  %v270_v34 = vld [vmem:[%s1468_s6 + $0x350] sm:$0xff] }
  0x6d   : > { %v1083_v38 = vpop.eup %1082  ;;  %868 = vmatprep.subr.mxu1 %v1081_v36  ;;  %1108 = vtanh.f32 %v198_v33  ;;  %v253_v36 = vld [vmem:[%s1468_s6 + $0x2c8] sm:$0xff] }
  0x6e   : > { %v1085_v40 = vpop.eup %1084  ;;  %835 = vmatpush3.xpose.msra.mxu0 %v1083_v38  ;;  %1110 = vtanh.f32 %v181_v35  ;;  %v285_v38 = vld [vmem:[%s1468_s6 + $0x3c8] sm:$0xff] }
  0x6f   : > { %v1087_v42 = vpop.eup %1086  ;;  %869 = vmatpush3.xpose.msra.mxu1 %v1085_v40  ;;  %1112 = vtanh.f32 %v213_v37  ;;  %v237_v40 = vld [vmem:[%s1468_s6 + $0x248] sm:$0xff] }
  0x70   : > { %v1089_v44 = vpop.eup %1088  ;;  %836 = vmatprep.subr.mxu0 %v1087_v42  ;;  %1114 = vtanh.f32 %v165_v39  ;;  %v269_v42 = vld [vmem:[%s1468_s6 + $0x348] sm:$0xff] }
  0x71   : > { %v1091_v46 = vpop.eup %1090  ;;  %870 = vmatprep.subr.mxu1 %v1089_v44  ;;  %1116 = vtanh.f32 %v197_v41  ;;  %v252_v44 = vld [vmem:[%s1468_s6 + $0x2c0] sm:$0xff] }
  0x72   : > { %v1093_v48 = vpop.eup %1092  ;;  %837 = vmatpush3.xpose.msra.mxu0 %v1091_v46  ;;  %1118 = vtanh.f32 %v180_v43  ;;  %v284_v46 = vld [vmem:[%s1468_s6 + $0x3c0] sm:$0xff] }
  0x73   : > { %v1095_v50 = vpop.eup %1094  ;;  %871 = vmatpush3.xpose.msra.mxu1 %v1093_v48  ;;  %1120 = vtanh.f32 %v212_v45  ;;  %v236_v48 = vld [vmem:[%s1468_s6 + $0x240] sm:$0xff] }
  0x74   : > { %v1097_v52 = vpop.eup %1096  ;;  %838 = vmatprep.subr.mxu0 %v1095_v50  ;;  %1122 = vtanh.f32 %v164_v47  ;;  %v268_v50 = vld [vmem:[%s1468_s6 + $0x340] sm:$0xff] }
  0x75   : > { %v1099_v54 = vpop.eup %1098  ;;  %872 = vmatprep.subr.mxu1 %v1097_v52  ;;  %1124 = vtanh.f32 %v196_v49  ;;  %v251_v52 = vld [vmem:[%s1468_s6 + $0x2b8] sm:$0xff] }
  0x76   : > { %v1101_v56 = vpop.eup %1100  ;;  %839 = vmatpush3.xpose.msra.mxu0 %v1099_v54  ;;  %1126 = vtanh.f32 %v259_v51  ;;  %v283_v54 = vld [vmem:[%s1468_s6 + $0x3b8] sm:$0xff] }
  0x77   : > { %v1103_v58 = vpop.eup %1102  ;;  %873 = vmatpush3.xpose.msra.mxu1 %v1101_v56  ;;  %1128 = vtanh.f32 %v291_v53  ;;  %v235_v56 = vld [vmem:[%s1468_s6 + $0x238] sm:$0xff] }
  0x78   : > { %v1105_v60 = vpop.eup %1104  ;;  %840 = vmatprep.subr.mxu0 %v1103_v58  ;;  %1130 = vtanh.f32 %v243_v55  ;;  %v267_v58 = vld [vmem:[%s1468_s6 + $0x338] sm:$0xff] }
  0x79   : > { %v1107_v62 = vpop.eup %1106  ;;  %874 = vmatprep.subr.mxu1 %v1105_v60  ;;  %1132 = vtanh.f32 %v275_v57  ;;  %v250_v60 = vld [vmem:[%s1468_s6 + $0x2b0] sm:$0xff] }
  0x7a   : > { %v1109_v0 = vpop.eup %1108  ;;  %841 = vmatpush3.xpose.msra.mxu0 %v1107_v62  ;;  %1134 = vtanh.f32 %v258_v59  ;;  %v282_v62 = vld [vmem:[%s1468_s6 + $0x3b0] sm:$0xff] }
  0x7b   : > { %v1111_v2 = vpop.eup %1110  ;;  %875 = vmatpush3.xpose.msra.mxu1 %v1109_v0  ;;  %1136 = vtanh.f32 %v290_v61  ;;  %v234_v0 = vld [vmem:[%s1468_s6 + $0x230] sm:$0xff] }
  0x7c   : > { %v1113_v4 = vpop.eup %1112  ;;  %842 = vmatprep.subr.mxu0 %v1111_v2  ;;  %1138 = vtanh.f32 %v242_v63  ;;  %v266_v2 = vld [vmem:[%s1468_s6 + $0x330] sm:$0xff] }
  0x7d   : > { %v1115_v6 = vpop.eup %1114  ;;  %876 = vmatprep.subr.mxu1 %v1113_v4  ;;  %1140 = vtanh.f32 %v274_v1  ;;  %v249_v4 = vld [vmem:[%s1468_s6 + $0x2a8] sm:$0xff] }
  0x7e   : > { %v1117_v8 = vpop.eup %1116  ;;  %843 = vmatpush3.xpose.msra.mxu0 %v1115_v6  ;;  %1142 = vtanh.f32 %v257_v3  ;;  %v281_v6 = vld [vmem:[%s1468_s6 + $0x3a8] sm:$0xff] }
  0x7f   : > { %v1119_v10 = vpop.eup %1118  ;;  %877 = vmatpush3.xpose.msra.mxu1 %v1117_v8  ;;  %1144 = vtanh.f32 %v289_v5  ;;  %v233_v8 = vld [vmem:[%s1468_s6 + $0x228] sm:$0xff] }
  0x80   : > { %v1121_v12 = vpop.eup %1120  ;;  %844 = vmatprep.subr.mxu0 %v1119_v10  ;;  %1146 = vtanh.f32 %v241_v7  ;;  %v265_v10 = vld [vmem:[%s1468_s6 + $0x328] sm:$0xff] }
  0x81   : > { %v1123_v14 = vpop.eup %1122  ;;  %878 = vmatprep.subr.mxu1 %v1121_v12  ;;  %1148 = vtanh.f32 %v273_v9  ;;  %v248_v12 = vld [vmem:[%s1468_s6 + $0x2a0] sm:$0xff] }
  0x82   : > { %v1125_v16 = vpop.eup %1124  ;;  %845 = vmatpush3.xpose.msra.mxu0 %v1123_v14  ;;  %1150 = vtanh.f32 %v256_v11  ;;  %v280_v14 = vld [vmem:[%s1468_s6 + $0x3a0] sm:$0xff] }
  0x83   : > { %v1127_v18 = vpop.eup %1126  ;;  %879 = vmatpush3.xpose.msra.mxu1 %v1125_v16  ;;  %1152 = vtanh.f32 %v288_v13  ;;  %v232_v16 = vld [vmem:[%s1468_s6 + $0x220] sm:$0xff] }
  0x84   : > { %v1129_v20 = vpop.eup %1128  ;;  %882 = vmatprep.subr.mxu0 %v1127_v18  ;;  %1154 = vtanh.f32 %v240_v15  ;;  %v264_v18 = vld [vmem:[%s1468_s6 + $0x320] sm:$0xff] }
  0x85   : > { %v1131_v22 = vpop.eup %1130  ;;  %847 = vmatmul.mubr.f32.vlgmr.msra.gmra.mxu0 %v1501_v32  ;;  %916 = vmatprep.subr.mxu1 %v1129_v20  ;;  %1156 = vtanh.f32 %v272_v17  ;;  %v247_v20 = vld [vmem:[%s1468_s6 + $0x298] sm:$0xff] }
  0x86   : > { %v1133_v24 = vpop.eup %1132  ;;  %881 = vmatmul.mubr.f32.vlgmr.msra.gmra.mxu1 %v1501_v32  ;;  %883 = vmatpush3.xpose.msra.mxu0 %v1131_v22  ;;  %1158 = vtanh.f32 %v255_v19  ;;  %v279_v22 = vld [vmem:[%s1468_s6 + $0x398] sm:$0xff] }
  0x87   : > { %v1135_v26 = vpop.eup %1134  ;;  %917 = vmatpush3.xpose.msra.mxu1 %v1133_v24  ;;  %1160 = vtanh.f32 %v287_v21  ;;  %914 = vmatprep.mubr.f32.mxu0 %v1501_v32  ;;  %v231_v24 = vld [vmem:[%s1468_s6 + $0x218] sm:$0xff] }
  0x88   : > { %v1137_v28 = vpop.eup %1136  ;;  %884 = vmatprep.subr.mxu0 %v1135_v26  ;;  %1162 = vtanh.f32 %v239_v23  ;;  %948 = vmatprep.mubr.f32.mxu1 %v1501_v32  ;;  %v263_v26 = vld [vmem:[%s1468_s6 + $0x318] sm:$0xff] }
  0x89   : > { %v1139_v30 = vpop.eup %1138  ;;  %918 = vmatprep.subr.mxu1 %v1137_v28  ;;  %1164 = vtanh.f32 %v271_v25  ;;  %v246_v28 = vld [vmem:[%s1468_s6 + $0x290] sm:$0xff] }
  0x8a   : > { %v1141_v33 = vpop.eup %1140  ;;  %885 = vmatpush3.xpose.msra.mxu0 %v1139_v30  ;;  %1166 = vtanh.f32 %v254_v27  ;;  %v278_v30 = vld [vmem:[%s1468_s6 + $0x390] sm:$0xff] }
  0x8b   : > { %v1143_v35 = vpop.eup %1142  ;;  %919 = vmatpush3.xpose.msra.mxu1 %v1141_v33  ;;  %1168 = vtanh.f32 %v286_v29  ;;  %v230_v33 = vld [vmem:[%s1468_s6 + $0x210] sm:$0xff] }
  0x8c   : > { %v1145_v37 = vpop.eup %1144  ;;  %886 = vmatprep.subr.mxu0 %v1143_v35  ;;  %1170 = vtanh.f32 %v238_v31  ;;  %v262_v35 = vld [vmem:[%s1468_s6 + $0x310] sm:$0xff] }
  0x8d   : > { %v1147_v39 = vpop.eup %1146  ;;  %920 = vmatprep.subr.mxu1 %v1145_v37  ;;  %1172 = vtanh.f32 %v270_v34  ;;  %v245_v37 = vld [vmem:[%s1468_s6 + $0x288] sm:$0xff] }
  0x8e   : > { %v1149_v41 = vpop.eup %1148  ;;  %887 = vmatpush3.xpose.msra.mxu0 %v1147_v39  ;;  %1174 = vtanh.f32 %v253_v36  ;;  %v277_v39 = vld [vmem:[%s1468_s6 + $0x388] sm:$0xff] }
  0x8f   : > { %v1151_v43 = vpop.eup %1150  ;;  %921 = vmatpush3.xpose.msra.mxu1 %v1149_v41  ;;  %1176 = vtanh.f32 %v285_v38  ;;  %v229_v41 = vld [vmem:[%s1468_s6 + $0x208] sm:$0xff] }
  0x90   : > { %v1153_v45 = vpop.eup %1152  ;;  %888 = vmatprep.subr.mxu0 %v1151_v43  ;;  %1178 = vtanh.f32 %v237_v40  ;;  %v261_v43 = vld [vmem:[%s1468_s6 + $0x308] sm:$0xff] }
  0x91   : > { %v1155_v47 = vpop.eup %1154  ;;  %922 = vmatprep.subr.mxu1 %v1153_v45  ;;  %1180 = vtanh.f32 %v269_v42  ;;  %v244_v45 = vld [vmem:[%s1468_s6 + $0x280] sm:$0xff] }
  0x92   : > { %v1157_v49 = vpop.eup %1156  ;;  %889 = vmatpush3.xpose.msra.mxu0 %v1155_v47  ;;  %1182 = vtanh.f32 %v252_v44  ;;  %v276_v47 = vld [vmem:[%s1468_s6 + $0x380] sm:$0xff] }
  0x93   : > { %v1159_v51 = vpop.eup %1158  ;;  %923 = vmatpush3.xpose.msra.mxu1 %v1157_v49  ;;  %1184 = vtanh.f32 %v284_v46  ;;  %v228_v49 = vld [vmem:[%s1468_s6 + $0x200] sm:$0xff] }
  0x94   : > { %v1161_v53 = vpop.eup %1160  ;;  %890 = vmatprep.subr.mxu0 %v1159_v51  ;;  %1186 = vtanh.f32 %v236_v48  ;;  %v260_v51 = vld [vmem:[%s1468_s6 + $0x300] sm:$0xff] }
  0x95   : > { %v1163_v55 = vpop.eup %1162  ;;  %924 = vmatprep.subr.mxu1 %v1161_v53  ;;  %1188 = vtanh.f32 %v268_v50 }
  0x96   : > { %v1165_v57 = vpop.eup %1164  ;;  %891 = vmatpush3.xpose.msra.mxu0 %v1163_v55  ;;  %1190 = vtanh.f32 %v251_v52 }
  0x97   : > { %v1167_v59 = vpop.eup %1166  ;;  %925 = vmatpush3.xpose.msra.mxu1 %v1165_v57  ;;  %1192 = vtanh.f32 %v283_v54 }
  0x98   : > { %v1169_v61 = vpop.eup %1168  ;;  %892 = vmatprep.subr.mxu0 %v1167_v59  ;;  %1194 = vtanh.f32 %v235_v56 }
  0x99   : > { %v1171_v63 = vpop.eup %1170  ;;  %926 = vmatprep.subr.mxu1 %v1169_v61  ;;  %1196 = vtanh.f32 %v267_v58 }
  0x9a   : > { %v1173_v1 = vpop.eup %1172  ;;  %893 = vmatpush3.xpose.msra.mxu0 %v1171_v63  ;;  %1198 = vtanh.f32 %v250_v60 }
  0x9b   : > { %v1175_v3 = vpop.eup %1174  ;;  %927 = vmatpush3.xpose.msra.mxu1 %v1173_v1  ;;  %1200 = vtanh.f32 %v282_v62 }
  0x9c   : > { %v1177_v5 = vpop.eup %1176  ;;  %894 = vmatprep.subr.mxu0 %v1175_v3  ;;  %1202 = vtanh.f32 %v234_v0 }
  0x9d   : > { %v1179_v7 = vpop.eup %1178  ;;  %928 = vmatprep.subr.mxu1 %v1177_v5  ;;  %1204 = vtanh.f32 %v266_v2 }
  0x9e   : > { %v1181_v9 = vpop.eup %1180  ;;  %895 = vmatpush3.xpose.msra.mxu0 %v1179_v7  ;;  %1206 = vtanh.f32 %v249_v4 }
  0x9f   : > { %v1183_v11 = vpop.eup %1182  ;;  %929 = vmatpush3.xpose.msra.mxu1 %v1181_v9  ;;  %1208 = vtanh.f32 %v281_v6 }
  0xa0   : > { %v1185_v13 = vpop.eup %1184  ;;  %896 = vmatprep.subr.mxu0 %v1183_v11  ;;  %1210 = vtanh.f32 %v233_v8 }
  0xa1   : > { %v1187_v15 = vpop.eup %1186  ;;  %930 = vmatprep.subr.mxu1 %v1185_v13  ;;  %1212 = vtanh.f32 %v265_v10 }
  0xa2   : > { %v1189_v17 = vpop.eup %1188  ;;  %897 = vmatpush3.xpose.msra.mxu0 %v1187_v15  ;;  %1214 = vtanh.f32 %v248_v12 }
  0xa3   : > { %v1191_v19 = vpop.eup %1190  ;;  %931 = vmatpush3.xpose.msra.mxu1 %v1189_v17  ;;  %1216 = vtanh.f32 %v280_v14 }
  0xa4   : > { %v1193_v21 = vpop.eup %1192  ;;  %898 = vmatprep.subr.mxu0 %v1191_v19  ;;  %1218 = vtanh.f32 %v232_v16 }
  0xa5   : > { %v1195_v23 = vpop.eup %1194  ;;  %932 = vmatprep.subr.mxu1 %v1193_v21  ;;  %1220 = vtanh.f32 %v264_v18 }
  0xa6   : > { %v1197_v25 = vpop.eup %1196  ;;  %899 = vmatpush3.xpose.msra.mxu0 %v1195_v23  ;;  %1222 = vtanh.f32 %v247_v20 }
  0xa7   : > { %v1199_v27 = vpop.eup %1198  ;;  %933 = vmatpush3.xpose.msra.mxu1 %v1197_v25  ;;  %1224 = vtanh.f32 %v279_v22 }
  0xa8   : > { %v1201_v29 = vpop.eup %1200  ;;  %900 = vmatprep.subr.mxu0 %v1199_v27  ;;  %1226 = vtanh.f32 %v231_v24 }
  0xa9   : > { %v1203_v31 = vpop.eup %1202  ;;  %934 = vmatprep.subr.mxu1 %v1201_v29  ;;  %1228 = vtanh.f32 %v263_v26 }
  0xaa   : > { %v1205_v34 = vpop.eup %1204  ;;  %901 = vmatpush3.xpose.msra.mxu0 %v1203_v31  ;;  %1230 = vtanh.f32 %v246_v28 }
  0xab   : > { %v1207_v36 = vpop.eup %1206  ;;  %935 = vmatpush3.xpose.msra.mxu1 %v1205_v34  ;;  %1232 = vtanh.f32 %v278_v30 }
  0xac   : > { %v1209_v38 = vpop.eup %1208  ;;  %902 = vmatprep.subr.mxu0 %v1207_v36  ;;  %1234 = vtanh.f32 %v230_v33 }
  0xad   : > { %v1211_v40 = vpop.eup %1210  ;;  %936 = vmatprep.subr.mxu1 %v1209_v38  ;;  %1236 = vtanh.f32 %v262_v35 }
  0xae   : > { %v1213_v42 = vpop.eup %1212  ;;  %903 = vmatpush3.xpose.msra.mxu0 %v1211_v40  ;;  %1238 = vtanh.f32 %v245_v37 }
  0xaf   : > { %v1215_v44 = vpop.eup %1214  ;;  %937 = vmatpush3.xpose.msra.mxu1 %v1213_v42  ;;  %1240 = vtanh.f32 %v277_v39 }
  0xb0   : > { %v1217_v46 = vpop.eup %1216  ;;  %904 = vmatprep.subr.mxu0 %v1215_v44  ;;  %1242 = vtanh.f32 %v229_v41 }
  0xb1   : > { %v1219_v48 = vpop.eup %1218  ;;  %938 = vmatprep.subr.mxu1 %v1217_v46  ;;  %1244 = vtanh.f32 %v261_v43 }
  0xb2   : > { %v1221_v50 = vpop.eup %1220  ;;  %905 = vmatpush3.xpose.msra.mxu0 %v1219_v48  ;;  %1246 = vtanh.f32 %v244_v45 }
  0xb3   : > { %v1223_v52 = vpop.eup %1222  ;;  %939 = vmatpush3.xpose.msra.mxu1 %v1221_v50  ;;  %1248 = vtanh.f32 %v276_v47 }
  0xb4   : > { %v1225_v53 = vpop.eup %1224  ;;  %906 = vmatprep.subr.mxu0 %v1223_v52  ;;  %1250 = vtanh.f32 %v228_v49 }
  0xb5   : > { %v1227_v54 = vpop.eup %1226  ;;  %940 = vmatprep.subr.mxu1 %v1225_v53  ;;  %1252 = vtanh.f32 %v260_v51 }
  0xb6   : > { %v1229_v55 = vpop.eup %1228  ;;  %907 = vmatpush3.xpose.msra.mxu0 %v1227_v54 }
  0xb7   : > { %v1231_v56 = vpop.eup %1230  ;;  %941 = vmatpush3.xpose.msra.mxu1 %v1229_v55 }
  0xb8   : > { %v1233_v57 = vpop.eup %1232  ;;  %908 = vmatprep.subr.mxu0 %v1231_v56 }
  0xb9   : > { %v1235_v58 = vpop.eup %1234  ;;  %942 = vmatprep.subr.mxu1 %v1233_v57 }
  0xba   : > { %v1237_v59 = vpop.eup %1236  ;;  %909 = vmatpush3.xpose.msra.mxu0 %v1235_v58 }
  0xbb   : > { %v1239_v60 = vpop.eup %1238  ;;  %943 = vmatpush3.xpose.msra.mxu1 %v1237_v59 }
  0xbc   : > { %v1241_v61 = vpop.eup %1240  ;;  %910 = vmatprep.subr.mxu0 %v1239_v60 }
  0xbd   : > { %v1243_v62 = vpop.eup %1242  ;;  %944 = vmatprep.subr.mxu1 %v1241_v61 }
  0xbe   : > { %v1245_v63 = vpop.eup %1244  ;;  %911 = vmatpush3.xpose.msra.mxu0 %v1243_v62 }
  0xbf   : > { %v1247_v0 = vpop.eup %1246  ;;  %945 = vmatpush3.xpose.msra.mxu1 %v1245_v63 }
  0xc0   : > { %v1249_v1 = vpop.eup %1248  ;;  %912 = vmatprep.subr.mxu0 %v1247_v0 }
  0xc1   : > { %v1251_v2 = vpop.eup %1250  ;;  %946 = vmatprep.subr.mxu1 %v1249_v1 }
  0xc2   : > { %v1253_v3 = vpop.eup %1252  ;;  %913 = vmatpush3.xpose.msra.mxu0 %v1251_v2 }
  0xc3   : > { %947 = vmatpush3.xpose.msra.mxu1 %v1253_v3 }
  0xc5   : > { %915 = vmatmul.mubr.f32.vlgmr.msra.gmra.mxu0 %v1501_v32 }
  0xc6   : > { %949 = vmatmul.mubr.f32.vlgmr.msra.gmra.mxu1 %v1501_v32 }
 0x145   : > { %v487_v4 = vpop.f32.mrf.mxu0 }
 0x146   : > { %705 = vst [vmem:[%s161_s3] sm:$0xff] %v487_v4  ;;  %v558_v5 = vpop.f32.mrf.mxu1 }
 0x147   : > { %707 = vst [vmem:[%s161_s3 + $0x10] sm:$0xff] %v558_v5  ;;  %v489_v6 = vpop.f32.mrf.mxu0 }
 0x148   : > { %706 = vst [vmem:[%s161_s3 + $0x8] sm:$0xff] %v489_v6  ;;  %v560_v7 = vpop.f32.mrf.mxu1 }
 0x149   : > { %708 = vst [vmem:[%s161_s3 + $0x18] sm:$0xff] %v560_v7 }
 0x185   : > { %v629_v8 = vpop.f32.mrf.mxu0 }
 0x186   : > { %709 = vst [vmem:[%s161_s3 + $0x20] sm:$0xff] %v629_v8  ;;  %v700_v9 = vpop.f32.mrf.mxu1 }
 0x187   : > { %711 = vst [vmem:[%s161_s3 + $0x30] sm:$0xff] %v700_v9  ;;  %v631_v10 = vpop.f32.mrf.mxu0 }
 0x188   : > { %710 = vst [vmem:[%s161_s3 + $0x28] sm:$0xff] %v631_v10  ;;  %v702_v32 = vpop.f32.mrf.mxu1 }
 0x189   : > { %712 = vst [vmem:[%s161_s3 + $0x38] sm:$0xff] %v702_v32 }
 0x18a   : > { %1295 = shalt.err (!%p1292_p10)
}
 0x18b   : > { %s1296_s25 = scalar_lea.hbm %s1620_s16, 1024  ;;  %s1300_s29 = scalar_lea.hbm %s1665_s2, 2048 }
 0x18c   : > { %p1297_p0 = scmp.ne.s32.totalorder %s1620_s16, %s1296_s25  ;;  %p1301_p1 = scmp.lt.s32.totalorder %s1620_s16, %s1665_s2 }
 0x18d   : > { %p1302_p3 = scmp.lt.s32.totalorder %s1300_s29, %s1296_s25 }
 0x18e   : > { %p1298_p2 = pnand %p1297_p0, %p1674_p12 }
 0x18f   : > { %p1303_p6 = por %p1302_p3, %p1301_p1 }
 0x190   : > { %p1299_p9 = pneg %p1298_p2 }
 0x192   : > { %p1304_p11 = pnand %p1303_p6, %p1299_p9 }
 0x194   : > { %1307 = shalt.err (!%p1304_p11)
}
 0x195   : > { %952 = dma.vmem_to_hbm [thread:$0]  (%p1674_p12), %s1622_s7, 1024, %s1620_s16, %s714_s13  }
 0x196 PF: > { %s740_s20 = sand.u32 1, %s1334_s9   ;;  %p1675_p13 = scmp.ne.s32.totalorder %s1671_s22, 0 }
 0x197   : > { %p1676_p4 = scmp.ge.s32.totalorder %s1346_s12, 2  ;;  %s741_s28 = scalar_lea.sflag [#allocation4], %s740_s20 }
 0x199   : > { %p959_p5 = pnand %p1676_p4, %p1675_p13 }
 0x19b   : > { %p960_p7 = pneg %p959_p5 }
 0x19d   : > { %1329 = dma.done.wait (%p960_p7), %s741_s28, 1024  }
 0x19e   : > { %1331 = vsyncadd (%p960_p7), %s741_s28, 4294966272  ;;  %p15_p8 = scmp.ge.s32.totalorder %s1392_s15, 4   ;;  %s1677_s9 = smov %s1338_s10 }
 0x19f   : > { %s1678_s10 = smov %s1342_s11  ;;  %s1679_s11 = smov %s1404_s18 }
 0x1a0   : > { %s1680_s12 = smov %s1392_s15  ;;  %17 = sbr.rel (!%p15_p8) target bundleno = 5 (0x5), region = 73 }
 0x1a5   :  { %746 = vsyncpa [#allocation3], 1 }
 0x1a6   :  { %748 = vsyncpa [#allocation3 + $0x1], 1 }
 0x1a7   :  { %749 = vsyncpa [#allocation4], 1 }
 0x1a8   :  { %751 = vsyncpa [#allocation4 + $0x1], 1 }

</bundles_post_ra>
